<compile_context>
chip_gen: v7x
topology: tpu7x:2x2x1
jax: 0.10.0
libtpu: 0.0.40
codegen_flags: <defaults>
</compile_context>

<pallas_src>
import functools
import math

import jax
import jax.numpy as jnp
from jax import lax
from jax.experimental import pallas as pl
from jax.experimental.pallas import tpu as pltpu

_LN_EPS = 1e-5            # nn.LayerNorm default eps
_MiB = 1024 * 1024


@functools.lru_cache(maxsize=None)
def _vmem_limit_bytes():
    """Generation-aware VMEM budget with headroom for Mosaic internal scratch."""
    cap = 64 * _MiB
    try:
        info = pltpu.get_tpu_info()
        cap = int(getattr(info, "vmem_capacity_bytes", cap))
    except Exception:
        pass
    return int(max(32 * _MiB, min(cap - 16 * _MiB, 100 * _MiB)))


def _spec(block_shape, index_map, *, single_buffer=False):
    """BlockSpec helper; invariant / sequence-resident blocks get a single buffer."""
    if single_buffer:
        try:
            return pl.BlockSpec(block_shape, index_map,
                                pipeline_mode=pl.Buffered(1))
        except TypeError:  # older jax without pipeline_mode: keep default buffering
            pass
    return pl.BlockSpec(block_shape, index_map)


def _layernorm_f32(x, gamma, beta):
    """Row-wise LayerNorm in f32 (elementwise math kept in f32 on all TPU gens)."""
    mean = jnp.mean(x, axis=-1, keepdims=True)
    xc = x - mean
    var = jnp.mean(xc * xc, axis=-1, keepdims=True)
    return xc * lax.rsqrt(var + _LN_EPS) * gamma + beta


# --------------------------------------------------------------------------- #
# Kernel A: LayerNorm1 + fused Q|K|V projection -> head-major outputs.         #
# --------------------------------------------------------------------------- #
def _ln_qkv_kernel(x_ref, g1_ref, be1_ref, wqkv_ref, bqkv_ref,
                   q_ref, k_ref, v_ref, *, heads, d_head, d_model, compute_dtype):
    # x_ref : (tile, Dm)            residual-stream rows (pos added for layer 0)
    # q_ref : (heads, tile, Dh)     head-major Q for this row tile
    # k_ref : (heads, Dh, tile)     head-major, pre-transposed K
    # v_ref : (heads, tile, Dh)     head-major V
    x = x_ref[...].astype(jnp.float32)
    x2 = _layernorm_f32(x, g1_ref[...], be1_ref[...])
    qkv = jnp.dot(x2.astype(compute_dtype), wqkv_ref[...],
                  preferred_element_type=jnp.float32) + bqkv_ref[...]
    for h in range(heads):
        lo = h * d_head
        q_ref[h] = qkv[:, lo:lo + d_head].astype(q_ref.dtype)
        k_ref[h] = qkv[:, d_model + lo:d_model + lo + d_head].T.astype(k_ref.dtype)
        v_ref[h] = qkv[:, 2 * d_model + lo:2 * d_model + lo + d_head].astype(v_ref.dtype)


# --------------------------------------------------------------------------- #
# Kernel B: attention + per-head fused out-proj + residual + LN2 + FFN + res.  #
# --------------------------------------------------------------------------- #
def _attn_ffn_kernel(x_ref, q_ref, k_ref, v_ref, wo_ref, bo_ref, g2_ref, be2_ref,
                     w1_ref, b1_ref, w2_ref, b2_ref, out_ref, *,
                     heads, d_head, compute_dtype, approx_recip):
    # x_ref : (q_tile, Dm)          residual-stream rows for this query tile
    # q_ref : (heads, q_tile, Dh)   this query tile (head-major)
    # k_ref : (heads, Dh, S)        full sequence, pre-transposed (single buffer)
    # v_ref : (heads, S, Dh)        full sequence (single buffer)
    attn = None
    for h in range(heads):
        qh = q_ref[h]                                                  # (q_tile, Dh)
        kh = k_ref[h]                                                  # (Dh, S)
        s = jnp.dot(qh, kh, preferred_element_type=jnp.float32)       # (q_tile, S)
        m = jnp.max(s, axis=-1, keepdims=True)
        e = jnp.exp(s - m)
        denom = jnp.sum(e, axis=-1, keepdims=True)
        probs = e * pl.reciprocal(denom, approx=approx_recip)
        # TODO(synk): attention-probability dropout omitted (eval semantics).
        o_h = jnp.dot(probs.astype(compute_dtype), v_ref[h],
                      preferred_element_type=jnp.float32)             # (q_tile, Dh)
        lo = h * d_head
        contrib = jnp.dot(o_h.astype(compute_dtype),
                          wo_ref[lo:lo + d_head, :],                  # sublane slice
                          preferred_element_type=jnp.float32)         # (q_tile, Dm)
        attn = contrib if attn is None else attn + contrib

    # output-projection bias + residual 1 (dropout_1 == identity in eval)
    x1 = x_ref[...].astype(jnp.float32) + attn + bo_ref[...]

    # LayerNorm2 + FeedForward + residual 2 (dropouts == identity in eval)
    x2 = _layernorm_f32(x1, g2_ref[...], be2_ref[...])
    h1 = jnp.dot(x2.astype(compute_dtype), w1_ref[...],
                 preferred_element_type=jnp.float32) + b1_ref[...]
    h1 = jnp.maximum(h1, 0.0)
    ff = jnp.dot(h1.astype(compute_dtype), w2_ref[...],
                 preferred_element_type=jnp.float32) + b2_ref[...]
    out_ref[...] = (x1 + ff).astype(out_ref.dtype)


# --------------------------------------------------------------------------- #
# Wrappers                                                                     #
# --------------------------------------------------------------------------- #
def _row_tile(s, q_tile=None):
    if q_tile is not None:
        assert s % q_tile == 0
        return q_tile
    return 128 if (s >= 128 and s % 128 == 0) else s


def encoder_layer_forward(x, p, *, heads, pos=None, compute_dtype=jnp.bfloat16,
                          q_tile=None):
    """One EncoderLayer forward (eval mode) as two fused Pallas kernels."""
    B, S, Dm = x.shape
    assert Dm % heads == 0
    d_head = Dm // heads
    tile = _row_tile(S, q_tile)
    n_tiles = S // tile
    scale = 1.0 / math.sqrt(d_head)
    vmem_limit = _vmem_limit_bytes()

    # Fuse Q|K|V weights; fold 1/sqrt(d_head) into the Q columns/bias at trace time.
    wqkv = jnp.concatenate([p['wq'] * scale, p['wk'], p['wv']], axis=1)
    bqkv = jnp.concatenate([p['bq'] * scale, p['bk'], p['bv']])

    # Weights feed the MXU in compute_dtype; biases / LN params stay f32.
    wqkv_c = wqkv.astype(compute_dtype)
    wo_c = p['wo'].astype(compute_dtype)
    w1_c = p['w1'].astype(compute_dtype)
    w2_c = p['w2'].astype(compute_dtype)

    row = lambda v: v.reshape(1, -1).astype(jnp.float32)
    g1, be1 = row(p['g1']), row(p['be1'])
    g2, be2 = row(p['g2']), row(p['be2'])
    bqkv2, bo2, b12, b22 = row(bqkv), row(p['bo']), row(p['b1']), row(p['b2'])

    # norm_1(x + pos); the residual stream still uses the original x.
    ln_in = x + pos if pos is not None else x

    x_spec = pl.BlockSpec((pl.Squeezed(), tile, Dm), lambda b, i: (b, i, 0))
    const = lambda r, c, sb=False: _spec((r, c), lambda b, i: (0, 0),
                                         single_buffer=sb)

    # Head-major intermediates; K pre-transposed so the score matmul in Kernel B is
    # a plain (q_tile,Dh)x(Dh,S) MXU feed with no in-kernel transpose.
    q_out_spec = pl.BlockSpec((pl.Squeezed(), heads, tile, d_head),
                              lambda b, i: (b, 0, i, 0))
    k_out_spec = pl.BlockSpec((pl.Squeezed(), heads, d_head, tile),
                              lambda b, i: (b, 0, 0, i))
    v_out_spec = pl.BlockSpec((pl.Squeezed(), heads, tile, d_head),
                              lambda b, i: (b, 0, i, 0))

    # ---- Kernel A: LayerNorm1 + fused QKV projection ------------------------ #
    kernel_a = functools.partial(_ln_qkv_kernel, heads=heads, d_head=d_head,
                                 d_model=Dm, compute_dtype=compute_dtype)
    q, k, v = pl.pallas_call(
        kernel_a,
        out_shape=(jax.ShapeDtypeStruct((B, heads, S, d_head), compute_dtype),
                   jax.ShapeDtypeStruct((B, heads, d_head, S), compute_dtype),
                   jax.ShapeDtypeStruct((B, heads, S, d_head), compute_dtype)),
        grid_spec=pltpu.PrefetchScalarGridSpec(
            num_scalar_prefetch=0,
            grid=(B, n_tiles),
            in_specs=[x_spec,
                      const(1, Dm), const(1, Dm),
                      const(Dm, 3 * Dm, True), const(1, 3 * Dm)],
            out_specs=(q_out_spec, k_out_spec, v_out_spec)),
        compiler_params=pltpu.CompilerParams(
            dimension_semantics=("parallel", "parallel"),
            vmem_limit_bytes=vmem_limit),
    )(ln_in, g1, be1, wqkv_c, bqkv2)

    # ---- Kernel B: attention + out-proj + residual + LN2 + FFN + residual --- #
    q_in_spec = pl.BlockSpec((pl.Squeezed(), heads, tile, d_head),
                             lambda b, i: (b, 0, i, 0))
    k_in_spec = _spec((pl.Squeezed(), heads, d_head, S), lambda b, i: (b, 0, 0, 0),
                      single_buffer=True)
    v_in_spec = _spec((pl.Squeezed(), heads, S, d_head), lambda b, i: (b, 0, 0, 0),
                      single_buffer=True)

    kernel_b = functools.partial(
        _attn_ffn_kernel, heads=heads, d_head=d_head,
        compute_dtype=compute_dtype,
        approx_recip=(compute_dtype != jnp.float32))

    out = pl.pallas_call(
        kernel_b,
        out_shape=jax.ShapeDtypeStruct((B, S, Dm), x.dtype),
        grid_spec=pltpu.PrefetchScalarGridSpec(
            num_scalar_prefetch=0,
            grid=(B, n_tiles),
            in_specs=[x_spec,
                      q_in_spec, k_in_spec, v_in_spec,
                      const(Dm, Dm, True), const(1, Dm),
                      const(1, Dm), const(1, Dm),
                      const(Dm, 2 * Dm, True), const(1, 2 * Dm),
                      const(2 * Dm, Dm, True), const(1, Dm)],
            out_specs=x_spec),
        compiler_params=pltpu.CompilerParams(
            dimension_semantics=("parallel", "parallel"),
            vmem_limit_bytes=vmem_limit),
    )(x, q, k, v, wo_c, bo2, g2, be2, w1_c, b12, w2_c, b22)

    return out


def trans_block_forward(x, layer_params, *, heads, pos=None,
                        compute_dtype=jnp.bfloat16, q_tile=None):
    """transBlock.forward: stack of EncoderLayers; pos is added only in layer 0."""
    for i, p in enumerate(layer_params):
        x = encoder_layer_forward(x, p, heads=heads,
                                  pos=pos if i == 0 else None,
                                  compute_dtype=compute_dtype, q_tile=q_tile)
    return x


# --------------------------------------------------------------------------- #
# Plain-JAX reference (mirrors the PyTorch module in eval mode)                #
# --------------------------------------------------------------------------- #
def _ref_layernorm(x, g, b):
    mean = jnp.mean(x, axis=-1, keepdims=True)
    var = jnp.mean((x - mean) ** 2, axis=-1, keepdims=True)
    return (x - mean) / jnp.sqrt(var + _LN_EPS) * g + b


def _ref_mha(x, p, heads):
    B, S, Dm = x.shape
    Dh = Dm // heads

    def proj(w, b):
        t = jnp.dot(x, w, precision="highest") + b
        return t.reshape(B, S, heads, Dh).transpose(0, 2, 1, 3)

    q = proj(p['wq'], p['bq'])
    k = proj(p['wk'], p['bk'])
    v = proj(p['wv'], p['bv'])
    s = jnp.einsum('bhqd,bhkd->bhqk', q, k, precision="highest") / math.sqrt(Dh)
    probs = jax.nn.softmax(s, axis=-1)
    a = jnp.einsum('bhqk,bhkd->bhqd', probs, v, precision="highest")
    a = a.transpose(0, 2, 1, 3).reshape(B, S, Dm)
    return jnp.dot(a, p['wo'], precision="highest") + p['bo']


def _ref_encoder_layer(x, p, heads, pos=None):
    x2 = _ref_layernorm(x + pos if pos is not None else x, p['g1'], p['be1'])
    x = x + _ref_mha(x2, p, heads)
    x2 = _ref_layernorm(x, p['g2'], p['be2'])
    h = jnp.maximum(jnp.dot(x2, p['w1'], precision="highest") + p['b1'], 0.0)
    ff = jnp.dot(h, p['w2'], precision="highest") + p['b2']
    return x + ff


def trans_block_reference(x, layer_params, *, heads, pos=None):
    for i, p in enumerate(layer_params):
        x = _ref_encoder_layer(x, p, heads, pos=pos if i == 0 else None)
    return x


# --------------------------------------------------------------------------- #
# Demo / self-test                                                             #
# --------------------------------------------------------------------------- #
if __name__ == "__main__":
    B, S, Dm, H, N_TRANS = 2, 8, 32, 4, 2

    root = jax.random.PRNGKey(0)
    kx, kp, kl = jax.random.split(root, 3)
    layer_keys = jax.random.split(kl, N_TRANS)

    def init_layer(k):
        ks = jax.random.split(k, 16)
        w = lambda kk, i, o: 0.1 * jax.random.normal(kk, (i, o), jnp.float32)
        b = lambda kk, o: 0.1 * jax.random.normal(kk, (o,), jnp.float32)
        return {
            'g1': 1.0 + 0.1 * jax.random.normal(ks[0], (Dm,), jnp.float32),
            'be1': b(ks[1], Dm),
            'wq': w(ks[2], Dm, Dm), 'bq': b(ks[3], Dm),
            'wk': w(ks[4], Dm, Dm), 'bk': b(ks[5], Dm),
            'wv': w(ks[6], Dm, Dm), 'bv': b(ks[7], Dm),
            'wo': w(ks[8], Dm, Dm), 'bo': b(ks[9], Dm),
            'g2': 1.0 + 0.1 * jax.random.normal(ks[10], (Dm,), jnp.float32),
            'be2': b(ks[11], Dm),
            'w1': w(ks[12], Dm, 2 * Dm), 'b1': b(ks[13], 2 * Dm),
            'w2': w(ks[14], 2 * Dm, Dm), 'b2': b(ks[15], Dm),
        }

    params = [init_layer(k) for k in layer_keys]
    x = jax.random.normal(kx, (B, S, Dm), jnp.float32)
    pos = 0.1 * jax.random.normal(kp, (B, S, Dm), jnp.float32)

    ref = trans_block_reference(x, params, heads=H, pos=pos)

    fwd = jax.jit(trans_block_forward,
                  static_argnames=("heads", "compute_dtype", "q_tile"))

    # f32 compute path.
    out_f32 = jax.block_until_ready(
        fwd(x, params, heads=H, pos=pos, compute_dtype=jnp.float32))
    assert out_f32.shape == (B, S, Dm)
    err32 = float(jnp.max(jnp.abs(out_f32 - ref)))
    assert jnp.allclose(out_f32, ref, atol=1e-2, rtol=1e-2), f"f32 mismatch {err32}"

    # bf16-MXU path (f32 accumulation) — the production-performance configuration.
    out_bf16 = jax.block_until_ready(
        fwd(x, params, heads=H, pos=pos, compute_dtype=jnp.bfloat16))
    err16 = float(jnp.max(jnp.abs(out_bf16 - ref)))
    assert jnp.allclose(out_bf16, ref, atol=5e-2, rtol=5e-2), f"bf16 mismatch {err16}"

    print("KERNEL_OK")
</pallas_src>

<mosaic_0001>
module attributes {stable_mosaic.version = 11 : i64} {
  func.func @_attn_ffn_kernel(%arg0: i32, %arg1: i32, %arg2: memref<1x8x32xf32, #tpu.memory_space<vmem>>, %arg3: memref<1x4x8x8xf32, #tpu.memory_space<vmem>>, %arg4: memref<1x4x8x8xf32, #tpu.memory_space<vmem>>, %arg5: memref<1x4x8x8xf32, #tpu.memory_space<vmem>>, %arg6: memref<32x32xf32, #tpu.memory_space<vmem>>, %arg7: memref<1x32xf32, #tpu.memory_space<vmem>>, %arg8: memref<1x32xf32, #tpu.memory_space<vmem>>, %arg9: memref<1x32xf32, #tpu.memory_space<vmem>>, %arg10: memref<32x64xf32, #tpu.memory_space<vmem>>, %arg11: memref<1x64xf32, #tpu.memory_space<vmem>>, %arg12: memref<64x32xf32, #tpu.memory_space<vmem>>, %arg13: memref<1x32xf32, #tpu.memory_space<vmem>>, %arg14: memref<1x8x32xf32, #tpu.memory_space<vmem>>) attributes {dimension_semantics = [#tpu.dimension_semantics<parallel>, #tpu.dimension_semantics<parallel>], iteration_bounds = array<i64: 2, 1>, scalar_prefetch = 0 : i64, scratch_operands = 0 : i64, tpu.core_type = #tpu.core_type<tc>, window_params = [{transform_indices = @transform_0, window_bounds = array<i64: 1, 8, 32>}, {transform_indices = @transform_1, window_bounds = array<i64: 1, 4, 8, 8>}, {pipeline_mode = #tpu.pipeline_mode<synchronous>, transform_indices = @transform_2, window_bounds = array<i64: 1, 4, 8, 8>}, {pipeline_mode = #tpu.pipeline_mode<synchronous>, transform_indices = @transform_3, window_bounds = array<i64: 1, 4, 8, 8>}, {pipeline_mode = #tpu.pipeline_mode<synchronous>, transform_indices = @transform_4, window_bounds = array<i64: 32, 32>}, {pipeline_mode = #tpu.pipeline_mode<synchronous>, transform_indices = @transform_5, window_bounds = array<i64: 1, 32>}, {pipeline_mode = #tpu.pipeline_mode<synchronous>, transform_indices = @transform_6, window_bounds = array<i64: 1, 32>}, {pipeline_mode = #tpu.pipeline_mode<synchronous>, transform_indices = @transform_7, window_bounds = array<i64: 1, 32>}, {pipeline_mode = #tpu.pipeline_mode<synchronous>, transform_indices = @transform_8, window_bounds = array<i64: 32, 64>}, {pipeline_mode = #tpu.pipeline_mode<synchronous>, transform_indices = @transform_9, window_bounds = array<i64: 1, 64>}, {pipeline_mode = #tpu.pipeline_mode<synchronous>, transform_indices = @transform_10, window_bounds = array<i64: 64, 32>}, {pipeline_mode = #tpu.pipeline_mode<synchronous>, transform_indices = @transform_11, window_bounds = array<i64: 1, 32>}, {transform_indices = @transform_12, window_bounds = array<i64: 1, 8, 32>}]} {
    %c0 = arith.constant 0 : index
    %c0_0 = arith.constant 0 : index
    %c0_1 = arith.constant 0 : index
    %c0_2 = arith.constant 0 : index
    %0 = vector.load %arg3[%c0, %c0_0, %c0_1, %c0_2] : memref<1x4x8x8xf32, #tpu.memory_space<vmem>>, vector<1x1x8x8xf32>
    %1 = vector.shape_cast %0 : vector<1x1x8x8xf32> to vector<8x8xf32>
    %c0_3 = arith.constant 0 : index
    %c0_4 = arith.constant 0 : index
    %c0_5 = arith.constant 0 : index
    %c0_6 = arith.constant 0 : index
    %2 = vector.load %arg4[%c0_3, %c0_4, %c0_5, %c0_6] : memref<1x4x8x8xf32, #tpu.memory_space<vmem>>, vector<1x1x8x8xf32>
    %3 = vector.shape_cast %2 : vector<1x1x8x8xf32> to vector<8x8xf32>
    %cst = arith.constant dense<0.000000e+00> : vector<8x8xf32>
    %4 = tpu.matmul %1, %3, %cst {dimension_numbers = #tpu.dot_dimension_numbers<[1], [0], [0], [1], [0, 0, 1, 1], [], []>} : vector<8x8xf32>, vector<8x8xf32>, vector<8x8xf32> -> vector<8x8xf32>
    %cst_7 = arith.constant dense<0xFF800000> : vector<8xf32>
    %5 = vector.multi_reduction <maximumf>, %4, %cst_7 [1] : vector<8x8xf32> to vector<8xf32>
    %6 = vector.shape_cast %5 : vector<8xf32> to vector<8x1xf32>
    %7 = vector.broadcast %6 : vector<8x1xf32> to vector<8x8xf32>
    %8 = arith.subf %4, %7 : vector<8x8xf32>
    %9 = math.exp %8 : vector<8x8xf32>
    %cst_8 = arith.constant dense<0.000000e+00> : vector<8xf32>
    %10 = vector.multi_reduction <add>, %9, %cst_8 [1] : vector<8x8xf32> to vector<8xf32>
    %11 = vector.shape_cast %10 : vector<8xf32> to vector<8x1xf32>
    %12 = tpu.reciprocal %11 : vector<8x1xf32> -> vector<8x1xf32>
    %13 = vector.broadcast %12 : vector<8x1xf32> to vector<8x8xf32>
    %14 = arith.mulf %9, %13 : vector<8x8xf32>
    %c0_9 = arith.constant 0 : index
    %c0_10 = arith.constant 0 : index
    %c0_11 = arith.constant 0 : index
    %c0_12 = arith.constant 0 : index
    %15 = vector.load %arg5[%c0_9, %c0_10, %c0_11, %c0_12] : memref<1x4x8x8xf32, #tpu.memory_space<vmem>>, vector<1x1x8x8xf32>
    %16 = vector.shape_cast %15 : vector<1x1x8x8xf32> to vector<8x8xf32>
    %cst_13 = arith.constant dense<0.000000e+00> : vector<8x8xf32>
    %17 = tpu.matmul %14, %16, %cst_13 {dimension_numbers = #tpu.dot_dimension_numbers<[1], [0], [0], [1], [0, 0, 1, 1], [], []>} : vector<8x8xf32>, vector<8x8xf32>, vector<8x8xf32> -> vector<8x8xf32>
    %c0_14 = arith.constant 0 : index
    %c0_15 = arith.constant 0 : index
    %18 = vector.load %arg6[%c0_14, %c0_15] : memref<32x32xf32, #tpu.memory_space<vmem>>, vector<8x32xf32>
    %cst_16 = arith.constant dense<0.000000e+00> : vector<8x32xf32>
    %19 = tpu.matmul %17, %18, %cst_16 {dimension_numbers = #tpu.dot_dimension_numbers<[1], [0], [0], [1], [0, 0, 1, 1], [], []>} : vector<8x8xf32>, vector<8x32xf32>, vector<8x32xf32> -> vector<8x32xf32>
    %c0_17 = arith.constant 0 : index
    %c1 = arith.constant 1 : index
    %c0_18 = arith.constant 0 : index
    %c0_19 = arith.constant 0 : index
    %20 = vector.load %arg3[%c0_17, %c1, %c0_18, %c0_19] : memref<1x4x8x8xf32, #tpu.memory_space<vmem>>, vector<1x1x8x8xf32>
    %21 = vector.shape_cast %20 : vector<1x1x8x8xf32> to vector<8x8xf32>
    %c0_20 = arith.constant 0 : index
    %c1_21 = arith.constant 1 : index
    %c0_22 = arith.constant 0 : index
    %c0_23 = arith.constant 0 : index
    %22 = vector.load %arg4[%c0_20, %c1_21, %c0_22, %c0_23] : memref<1x4x8x8xf32, #tpu.memory_space<vmem>>, vector<1x1x8x8xf32>
    %23 = vector.shape_cast %22 : vector<1x1x8x8xf32> to vector<8x8xf32>
    %cst_24 = arith.constant dense<0.000000e+00> : vector<8x8xf32>
    %24 = tpu.matmul %21, %23, %cst_24 {dimension_numbers = #tpu.dot_dimension_numbers<[1], [0], [0], [1], [0, 0, 1, 1], [], []>} : vector<8x8xf32>, vector<8x8xf32>, vector<8x8xf32> -> vector<8x8xf32>
    %cst_25 = arith.constant dense<0xFF800000> : vector<8xf32>
    %25 = vector.multi_reduction <maximumf>, %24, %cst_25 [1] : vector<8x8xf32> to vector<8xf32>
    %26 = vector.shape_cast %25 : vector<8xf32> to vector<8x1xf32>
    %27 = vector.broadcast %26 : vector<8x1xf32> to vector<8x8xf32>
    %28 = arith.subf %24, %27 : vector<8x8xf32>
    %29 = math.exp %28 : vector<8x8xf32>
    %cst_26 = arith.constant dense<0.000000e+00> : vector<8xf32>
    %30 = vector.multi_reduction <add>, %29, %cst_26 [1] : vector<8x8xf32> to vector<8xf32>
    %31 = vector.shape_cast %30 : vector<8xf32> to vector<8x1xf32>
    %32 = tpu.reciprocal %31 : vector<8x1xf32> -> vector<8x1xf32>
    %33 = vector.broadcast %32 : vector<8x1xf32> to vector<8x8xf32>
    %34 = arith.mulf %29, %33 : vector<8x8xf32>
    %c0_27 = arith.constant 0 : index
    %c1_28 = arith.constant 1 : index
    %c0_29 = arith.constant 0 : index
    %c0_30 = arith.constant 0 : index
    %35 = vector.load %arg5[%c0_27, %c1_28, %c0_29, %c0_30] : memref<1x4x8x8xf32, #tpu.memory_space<vmem>>, vector<1x1x8x8xf32>
    %36 = vector.shape_cast %35 : vector<1x1x8x8xf32> to vector<8x8xf32>
    %cst_31 = arith.constant dense<0.000000e+00> : vector<8x8xf32>
    %37 = tpu.matmul %34, %36, %cst_31 {dimension_numbers = #tpu.dot_dimension_numbers<[1], [0], [0], [1], [0, 0, 1, 1], [], []>} : vector<8x8xf32>, vector<8x8xf32>, vector<8x8xf32> -> vector<8x8xf32>
    %c8 = arith.constant 8 : index
    %c0_32 = arith.constant 0 : index
    %38 = vector.load %arg6[%c8, %c0_32] : memref<32x32xf32, #tpu.memory_space<vmem>>, vector<8x32xf32>
    %cst_33 = arith.constant dense<0.000000e+00> : vector<8x32xf32>
    %39 = tpu.matmul %37, %38, %cst_33 {dimension_numbers = #tpu.dot_dimension_numbers<[1], [0], [0], [1], [0, 0, 1, 1], [], []>} : vector<8x8xf32>, vector<8x32xf32>, vector<8x32xf32> -> vector<8x32xf32>
    %40 = arith.addf %19, %39 : vector<8x32xf32>
    %c0_34 = arith.constant 0 : index
    %c2 = arith.constant 2 : index
    %c0_35 = arith.constant 0 : index
    %c0_36 = arith.constant 0 : index
    %41 = vector.load %arg3[%c0_34, %c2, %c0_35, %c0_36] : memref<1x4x8x8xf32, #tpu.memory_space<vmem>>, vector<1x1x8x8xf32>
    %42 = vector.shape_cast %41 : vector<1x1x8x8xf32> to vector<8x8xf32>
    %c0_37 = arith.constant 0 : index
    %c2_38 = arith.constant 2 : index
    %c0_39 = arith.constant 0 : index
    %c0_40 = arith.constant 0 : index
    %43 = vector.load %arg4[%c0_37, %c2_38, %c0_39, %c0_40] : memref<1x4x8x8xf32, #tpu.memory_space<vmem>>, vector<1x1x8x8xf32>
    %44 = vector.shape_cast %43 : vector<1x1x8x8xf32> to vector<8x8xf32>
    %cst_41 = arith.constant dense<0.000000e+00> : vector<8x8xf32>
    %45 = tpu.matmul %42, %44, %cst_41 {dimension_numbers = #tpu.dot_dimension_numbers<[1], [0], [0], [1], [0, 0, 1, 1], [], []>} : vector<8x8xf32>, vector<8x8xf32>, vector<8x8xf32> -> vector<8x8xf32>
    %cst_42 = arith.constant dense<0xFF800000> : vector<8xf32>
    %46 = vector.multi_reduction <maximumf>, %45, %cst_42 [1] : vector<8x8xf32> to vector<8xf32>
    %47 = vector.shape_cast %46 : vector<8xf32> to vector<8x1xf32>
    %48 = vector.broadcast %47 : vector<8x1xf32> to vector<8x8xf32>
    %49 = arith.subf %45, %48 : vector<8x8xf32>
    %50 = math.exp %49 : vector<8x8xf32>
    %cst_43 = arith.constant dense<0.000000e+00> : vector<8xf32>
    %51 = vector.multi_reduction <add>, %50, %cst_43 [1] : vector<8x8xf32> to vector<8xf32>
    %52 = vector.shape_cast %51 : vector<8xf32> to vector<8x1xf32>
    %53 = tpu.reciprocal %52 : vector<8x1xf32> -> vector<8x1xf32>
    %54 = vector.broadcast %53 : vector<8x1xf32> to vector<8x8xf32>
    %55 = arith.mulf %50, %54 : vector<8x8xf32>
    %c0_44 = arith.constant 0 : index
    %c2_45 = arith.constant 2 : index
    %c0_46 = arith.constant 0 : index
    %c0_47 = arith.constant 0 : index
    %56 = vector.load %arg5[%c0_44, %c2_45, %c0_46, %c0_47] : memref<1x4x8x8xf32, #tpu.memory_space<vmem>>, vector<1x1x8x8xf32>
    %57 = vector.shape_cast %56 : vector<1x1x8x8xf32> to vector<8x8xf32>
    %cst_48 = arith.constant dense<0.000000e+00> : vector<8x8xf32>
    %58 = tpu.matmul %55, %57, %cst_48 {dimension_numbers = #tpu.dot_dimension_numbers<[1], [0], [0], [1], [0, 0, 1, 1], [], []>} : vector<8x8xf32>, vector<8x8xf32>, vector<8x8xf32> -> vector<8x8xf32>
    %c16 = arith.constant 16 : index
    %c0_49 = arith.constant 0 : index
    %59 = vector.load %arg6[%c16, %c0_49] : memref<32x32xf32, #tpu.memory_space<vmem>>, vector<8x32xf32>
    %cst_50 = arith.constant dense<0.000000e+00> : vector<8x32xf32>
    %60 = tpu.matmul %58, %59, %cst_50 {dimension_numbers = #tpu.dot_dimension_numbers<[1], [0], [0], [1], [0, 0, 1, 1], [], []>} : vector<8x8xf32>, vector<8x32xf32>, vector<8x32xf32> -> vector<8x32xf32>
    %61 = arith.addf %40, %60 : vector<8x32xf32>
    %c0_51 = arith.constant 0 : index
    %c3 = arith.constant 3 : index
    %c0_52 = arith.constant 0 : index
    %c0_53 = arith.constant 0 : index
    %62 = vector.load %arg3[%c0_51, %c3, %c0_52, %c0_53] : memref<1x4x8x8xf32, #tpu.memory_space<vmem>>, vector<1x1x8x8xf32>
    %63 = vector.shape_cast %62 : vector<1x1x8x8xf32> to vector<8x8xf32>
    %c0_54 = arith.constant 0 : index
    %c3_55 = arith.constant 3 : index
    %c0_56 = arith.constant 0 : index
    %c0_57 = arith.constant 0 : index
    %64 = vector.load %arg4[%c0_54, %c3_55, %c0_56, %c0_57] : memref<1x4x8x8xf32, #tpu.memory_space<vmem>>, vector<1x1x8x8xf32>
    %65 = vector.shape_cast %64 : vector<1x1x8x8xf32> to vector<8x8xf32>
    %cst_58 = arith.constant dense<0.000000e+00> : vector<8x8xf32>
    %66 = tpu.matmul %63, %65, %cst_58 {dimension_numbers = #tpu.dot_dimension_numbers<[1], [0], [0], [1], [0, 0, 1, 1], [], []>} : vector<8x8xf32>, vector<8x8xf32>, vector<8x8xf32> -> vector<8x8xf32>
    %cst_59 = arith.constant dense<0xFF800000> : vector<8xf32>
    %67 = vector.multi_reduction <maximumf>, %66, %cst_59 [1] : vector<8x8xf32> to vector<8xf32>
    %68 = vector.shape_cast %67 : vector<8xf32> to vector<8x1xf32>
    %69 = vector.broadcast %68 : vector<8x1xf32> to vector<8x8xf32>
    %70 = arith.subf %66, %69 : vector<8x8xf32>
    %71 = math.exp %70 : vector<8x8xf32>
    %cst_60 = arith.constant dense<0.000000e+00> : vector<8xf32>
    %72 = vector.multi_reduction <add>, %71, %cst_60 [1] : vector<8x8xf32> to vector<8xf32>
    %73 = vector.shape_cast %72 : vector<8xf32> to vector<8x1xf32>
    %74 = tpu.reciprocal %73 : vector<8x1xf32> -> vector<8x1xf32>
    %75 = vector.broadcast %74 : vector<8x1xf32> to vector<8x8xf32>
    %76 = arith.mulf %71, %75 : vector<8x8xf32>
    %c0_61 = arith.constant 0 : index
    %c3_62 = arith.constant 3 : index
    %c0_63 = arith.constant 0 : index
    %c0_64 = arith.constant 0 : index
    %77 = vector.load %arg5[%c0_61, %c3_62, %c0_63, %c0_64] : memref<1x4x8x8xf32, #tpu.memory_space<vmem>>, vector<1x1x8x8xf32>
    %78 = vector.shape_cast %77 : vector<1x1x8x8xf32> to vector<8x8xf32>
    %cst_65 = arith.constant dense<0.000000e+00> : vector<8x8xf32>
    %79 = tpu.matmul %76, %78, %cst_65 {dimension_numbers = #tpu.dot_dimension_numbers<[1], [0], [0], [1], [0, 0, 1, 1], [], []>} : vector<8x8xf32>, vector<8x8xf32>, vector<8x8xf32> -> vector<8x8xf32>
    %c24 = arith.constant 24 : index
    %c0_66 = arith.constant 0 : index
    %80 = vector.load %arg6[%c24, %c0_66] : memref<32x32xf32, #tpu.memory_space<vmem>>, vector<8x32xf32>
    %cst_67 = arith.constant dense<0.000000e+00> : vector<8x32xf32>
    %81 = tpu.matmul %79, %80, %cst_67 {dimension_numbers = #tpu.dot_dimension_numbers<[1], [0], [0], [1], [0, 0, 1, 1], [], []>} : vector<8x8xf32>, vector<8x32xf32>, vector<8x32xf32> -> vector<8x32xf32>
    %82 = arith.addf %61, %81 : vector<8x32xf32>
    %c0_68 = arith.constant 0 : index
    %c0_69 = arith.constant 0 : index
    %c0_70 = arith.constant 0 : index
    %83 = vector.load %arg2[%c0_68, %c0_69, %c0_70] : memref<1x8x32xf32, #tpu.memory_space<vmem>>, vector<1x8x32xf32>
    %84 = vector.shape_cast %83 : vector<1x8x32xf32> to vector<8x32xf32>
    %85 = arith.addf %84, %82 : vector<8x32xf32>
    %c0_71 = arith.constant 0 : index
    %c0_72 = arith.constant 0 : index
    %86 = vector.load %arg7[%c0_71, %c0_72] : memref<1x32xf32, #tpu.memory_space<vmem>>, vector<1x32xf32>
    %87 = vector.broadcast %86 : vector<1x32xf32> to vector<8x32xf32>
    %88 = arith.addf %85, %87 : vector<8x32xf32>
    %c0_73 = arith.constant 0 : index
    %c0_74 = arith.constant 0 : index
    %89 = vector.load %arg8[%c0_73, %c0_74] : memref<1x32xf32, #tpu.memory_space<vmem>>, vector<1x32xf32>
    %c0_75 = arith.constant 0 : index
    %c0_76 = arith.constant 0 : index
    %90 = vector.load %arg9[%c0_75, %c0_76] : memref<1x32xf32, #tpu.memory_space<vmem>>, vector<1x32xf32>
    %cst_77 = arith.constant dense<0.000000e+00> : vector<8xf32>
    %91 = vector.multi_reduction <add>, %88, %cst_77 [1] : vector<8x32xf32> to vector<8xf32>
    %92 = vector.shape_cast %91 : vector<8xf32> to vector<8x1xf32>
    %cst_78 = arith.constant 3.200000e+01 : f32
    %93 = vector.broadcast %cst_78 : f32 to vector<8x1xf32>
    %94 = arith.divf %92, %93 : vector<8x1xf32>
    %95 = vector.broadcast %94 : vector<8x1xf32> to vector<8x32xf32>
    %96 = arith.subf %88, %95 : vector<8x32xf32>
    %97 = arith.mulf %96, %96 : vector<8x32xf32>
    %cst_79 = arith.constant dense<0.000000e+00> : vector<8xf32>
    %98 = vector.multi_reduction <add>, %97, %cst_79 [1] : vector<8x32xf32> to vector<8xf32>
    %99 = vector.shape_cast %98 : vector<8xf32> to vector<8x1xf32>
    %cst_80 = arith.constant 3.200000e+01 : f32
    %100 = vector.broadcast %cst_80 : f32 to vector<8x1xf32>
    %101 = arith.divf %99, %100 : vector<8x1xf32>
    %cst_81 = arith.constant 9.99999974E-6 : f32
    %102 = vector.broadcast %cst_81 : f32 to vector<8x1xf32>
    %103 = arith.addf %101, %102 : vector<8x1xf32>
    %104 = math.rsqrt %103 : vector<8x1xf32>
    %105 = vector.broadcast %104 : vector<8x1xf32> to vector<8x32xf32>
    %106 = arith.mulf %96, %105 : vector<8x32xf32>
    %107 = vector.broadcast %89 : vector<1x32xf32> to vector<8x32xf32>
    %108 = arith.mulf %106, %107 : vector<8x32xf32>
    %109 = vector.broadcast %90 : vector<1x32xf32> to vector<8x32xf32>
    %110 = arith.addf %108, %109 : vector<8x32xf32>
    %c0_82 = arith.constant 0 : index
    %c0_83 = arith.constant 0 : index
    %111 = vector.load %arg10[%c0_82, %c0_83] : memref<32x64xf32, #tpu.memory_space<vmem>>, vector<32x64xf32>
    %cst_84 = arith.constant dense<0.000000e+00> : vector<8x64xf32>
    %112 = tpu.matmul %110, %111, %cst_84 {dimension_numbers = #tpu.dot_dimension_numbers<[1], [0], [0], [1], [0, 0, 1, 1], [], []>} : vector<8x32xf32>, vector<32x64xf32>, vector<8x64xf32> -> vector<8x64xf32>
    %c0_85 = arith.constant 0 : index
    %c0_86 = arith.constant 0 : index
    %113 = vector.load %arg11[%c0_85, %c0_86] : memref<1x64xf32, #tpu.memory_space<vmem>>, vector<1x64xf32>
    %114 = vector.broadcast %113 : vector<1x64xf32> to vector<8x64xf32>
    %115 = arith.addf %112, %114 : vector<8x64xf32>
    %cst_87 = arith.constant 0.000000e+00 : f32
    %116 = vector.broadcast %cst_87 : f32 to vector<8x64xf32>
    %117 = arith.maximumf %115, %116 : vector<8x64xf32>
    %c0_88 = arith.constant 0 : index
    %c0_89 = arith.constant 0 : index
    %118 = vector.load %arg12[%c0_88, %c0_89] : memref<64x32xf32, #tpu.memory_space<vmem>>, vector<64x32xf32>
    %cst_90 = arith.constant dense<0.000000e+00> : vector<8x32xf32>
    %119 = tpu.matmul %117, %118, %cst_90 {dimension_numbers = #tpu.dot_dimension_numbers<[1], [0], [0], [1], [0, 0, 1, 1], [], []>} : vector<8x64xf32>, vector<64x32xf32>, vector<8x32xf32> -> vector<8x32xf32>
    %c0_91 = arith.constant 0 : index
    %c0_92 = arith.constant 0 : index
    %120 = vector.load %arg13[%c0_91, %c0_92] : memref<1x32xf32, #tpu.memory_space<vmem>>, vector<1x32xf32>
    %121 = vector.broadcast %120 : vector<1x32xf32> to vector<8x32xf32>
    %122 = arith.addf %119, %121 : vector<8x32xf32>
    %123 = arith.addf %88, %122 : vector<8x32xf32>
    %c0_93 = arith.constant 0 : index
    %c0_94 = arith.constant 0 : index
    %c0_95 = arith.constant 0 : index
    %124 = vector.load %arg14[%c0_93, %c0_94, %c0_95] : memref<1x8x32xf32, #tpu.memory_space<vmem>>, vector<1x8x32xf32>
    %125 = vector.shape_cast %124 : vector<1x8x32xf32> to vector<8x32xf32>
    %126 = vector.shape_cast %123 : vector<8x32xf32> to vector<1x8x32xf32>
    tpu.vector_store %arg14[%c0_93, %c0_94, %c0_95], %126 {strides = array<i32>} : memref<1x8x32xf32, #tpu.memory_space<vmem>>, vector<1x8x32xf32>,
    return
  }
  func.func @transform_0(%arg0: i32, %arg1: i32) -> (i32, i32, i32) {
    %c0_i32 = arith.constant 0 : i32
    %c0_i32_0 = arith.constant 0 : i32
    return %arg0, %arg1, %c0_i32 : i32, i32, i32
  }
  func.func @transform_1(%arg0: i32, %arg1: i32) -> (i32, i32, i32, i32) {
    %c0_i32 = arith.constant 0 : i32
    %c0_i32_0 = arith.constant 0 : i32
    %c0_i32_1 = arith.constant 0 : i32
    return %arg0, %c0_i32, %arg1, %c0_i32_0 : i32, i32, i32, i32
  }
  func.func @transform_2(%arg0: i32, %arg1: i32) -> (i32, i32, i32, i32) {
    %c0_i32 = arith.constant 0 : i32
    %c0_i32_0 = arith.constant 0 : i32
    %c0_i32_1 = arith.constant 0 : i32
    %c0_i32_2 = arith.constant 0 : i32
    return %arg0, %c0_i32, %c0_i32_0, %c0_i32_1 : i32, i32, i32, i32
  }
  func.func @transform_3(%arg0: i32, %arg1: i32) -> (i32, i32, i32, i32) {
    %c0_i32 = arith.constant 0 : i32
    %c0_i32_0 = arith.constant 0 : i32
    %c0_i32_1 = arith.constant 0 : i32
    %c0_i32_2 = arith.constant 0 : i32
    return %arg0, %c0_i32, %c0_i32_0, %c0_i32_1 : i32, i32, i32, i32
  }
  func.func @transform_4(%arg0: i32, %arg1: i32) -> (i32, i32) {
    %c0_i32 = arith.constant 0 : i32
    %c0_i32_0 = arith.constant 0 : i32
    %c0_i32_1 = arith.constant 0 : i32
    return %c0_i32, %c0_i32_0 : i32, i32
  }
  func.func @transform_5(%arg0: i32, %arg1: i32) -> (i32, i32) {
    %c0_i32 = arith.constant 0 : i32
    %c0_i32_0 = arith.constant 0 : i32
    %c0_i32_1 = arith.constant 0 : i32
    return %c0_i32, %c0_i32_0 : i32, i32
  }
  func.func @transform_6(%arg0: i32, %arg1: i32) -> (i32, i32) {
    %c0_i32 = arith.constant 0 : i32
    %c0_i32_0 = arith.constant 0 : i32
    %c0_i32_1 = arith.constant 0 : i32
    return %c0_i32, %c0_i32_0 : i32, i32
  }
  func.func @transform_7(%arg0: i32, %arg1: i32) -> (i32, i32) {
    %c0_i32 = arith.constant 0 : i32
    %c0_i32_0 = arith.constant 0 : i32
    %c0_i32_1 = arith.constant 0 : i32
    return %c0_i32, %c0_i32_0 : i32, i32
  }
  func.func @transform_8(%arg0: i32, %arg1: i32) -> (i32, i32) {
    %c0_i32 = arith.constant 0 : i32
    %c0_i32_0 = arith.constant 0 : i32
    %c0_i32_1 = arith.constant 0 : i32
    return %c0_i32, %c0_i32_0 : i32, i32
  }
  func.func @transform_9(%arg0: i32, %arg1: i32) -> (i32, i32) {
    %c0_i32 = arith.constant 0 : i32
    %c0_i32_0 = arith.constant 0 : i32
    %c0_i32_1 = arith.constant 0 : i32
    return %c0_i32, %c0_i32_0 : i32, i32
  }
  func.func @transform_10(%arg0: i32, %arg1: i32) -> (i32, i32) {
    %c0_i32 = arith.constant 0 : i32
    %c0_i32_0 = arith.constant 0 : i32
    %c0_i32_1 = arith.constant 0 : i32
    return %c0_i32, %c0_i32_0 : i32, i32
  }
  func.func @transform_11(%arg0: i32, %arg1: i32) -> (i32, i32) {
    %c0_i32 = arith.constant 0 : i32
    %c0_i32_0 = arith.constant 0 : i32
    %c0_i32_1 = arith.constant 0 : i32
    return %c0_i32, %c0_i32_0 : i32, i32
  }
  func.func @transform_12(%arg0: i32, %arg1: i32) -> (i32, i32, i32) {
    %c0_i32 = arith.constant 0 : i32
    %c0_i32_0 = arith.constant 0 : i32
    return %arg0, %arg1, %c0_i32 : i32, i32, i32
  }
}

module attributes {stable_mosaic.version = 11 : i64} {
  func.func @_ln_qkv_kernel(%arg0: i32, %arg1: i32, %arg2: memref<1x8x32xf32, #tpu.memory_space<vmem>>, %arg3: memref<1x32xf32, #tpu.memory_space<vmem>>, %arg4: memref<1x32xf32, #tpu.memory_space<vmem>>, %arg5: memref<32x96xf32, #tpu.memory_space<vmem>>, %arg6: memref<1x96xf32, #tpu.memory_space<vmem>>, %arg7: memref<1x4x8x8xf32, #tpu.memory_space<vmem>>, %arg8: memref<1x4x8x8xf32, #tpu.memory_space<vmem>>, %arg9: memref<1x4x8x8xf32, #tpu.memory_space<vmem>>) attributes {dimension_semantics = [#tpu.dimension_semantics<parallel>, #tpu.dimension_semantics<parallel>], iteration_bounds = array<i64: 2, 1>, scalar_prefetch = 0 : i64, scratch_operands = 0 : i64, tpu.core_type = #tpu.core_type<tc>, window_params = [{transform_indices = @transform_0, window_bounds = array<i64: 1, 8, 32>}, {pipeline_mode = #tpu.pipeline_mode<synchronous>, transform_indices = @transform_1, window_bounds = array<i64: 1, 32>}, {pipeline_mode = #tpu.pipeline_mode<synchronous>, transform_indices = @transform_2, window_bounds = array<i64: 1, 32>}, {pipeline_mode = #tpu.pipeline_mode<synchronous>, transform_indices = @transform_3, window_bounds = array<i64: 32, 96>}, {pipeline_mode = #tpu.pipeline_mode<synchronous>, transform_indices = @transform_4, window_bounds = array<i64: 1, 96>}, {transform_indices = @transform_5, window_bounds = array<i64: 1, 4, 8, 8>}, {transform_indices = @transform_6, window_bounds = array<i64: 1, 4, 8, 8>}, {transform_indices = @transform_7, window_bounds = array<i64: 1, 4, 8, 8>}]} {
    %c0 = arith.constant 0 : index
    %c0_0 = arith.constant 0 : index
    %c0_1 = arith.constant 0 : index
    %0 = vector.load %arg2[%c0, %c0_0, %c0_1] : memref<1x8x32xf32, #tpu.memory_space<vmem>>, vector<1x8x32xf32>
    %1 = vector.shape_cast %0 : vector<1x8x32xf32> to vector<8x32xf32>
    %c0_2 = arith.constant 0 : index
    %c0_3 = arith.constant 0 : index
    %2 = vector.load %arg3[%c0_2, %c0_3] : memref<1x32xf32, #tpu.memory_space<vmem>>, vector<1x32xf32>
    %c0_4 = arith.constant 0 : index
    %c0_5 = arith.constant 0 : index
    %3 = vector.load %arg4[%c0_4, %c0_5] : memref<1x32xf32, #tpu.memory_space<vmem>>, vector<1x32xf32>
    %cst = arith.constant dense<0.000000e+00> : vector<8xf32>
    %4 = vector.multi_reduction <add>, %1, %cst [1] : vector<8x32xf32> to vector<8xf32>
    %5 = vector.shape_cast %4 : vector<8xf32> to vector<8x1xf32>
    %cst_6 = arith.constant 3.200000e+01 : f32
    %6 = vector.broadcast %cst_6 : f32 to vector<8x1xf32>
    %7 = arith.divf %5, %6 : vector<8x1xf32>
    %8 = vector.broadcast %7 : vector<8x1xf32> to vector<8x32xf32>
    %9 = arith.subf %1, %8 : vector<8x32xf32>
    %10 = arith.mulf %9, %9 : vector<8x32xf32>
    %cst_7 = arith.constant dense<0.000000e+00> : vector<8xf32>
    %11 = vector.multi_reduction <add>, %10, %cst_7 [1] : vector<8x32xf32> to vector<8xf32>
    %12 = vector.shape_cast %11 : vector<8xf32> to vector<8x1xf32>
    %cst_8 = arith.constant 3.200000e+01 : f32
    %13 = vector.broadcast %cst_8 : f32 to vector<8x1xf32>
    %14 = arith.divf %12, %13 : vector<8x1xf32>
    %cst_9 = arith.constant 9.99999974E-6 : f32
    %15 = vector.broadcast %cst_9 : f32 to vector<8x1xf32>
    %16 = arith.addf %14, %15 : vector<8x1xf32>
    %17 = math.rsqrt %16 : vector<8x1xf32>
    %18 = vector.broadcast %17 : vector<8x1xf32> to vector<8x32xf32>
    %19 = arith.mulf %9, %18 : vector<8x32xf32>
    %20 = vector.broadcast %2 : vector<1x32xf32> to vector<8x32xf32>
    %21 = arith.mulf %19, %20 : vector<8x32xf32>
    %22 = vector.broadcast %3 : vector<1x32xf32> to vector<8x32xf32>
    %23 = arith.addf %21, %22 : vector<8x32xf32>
    %c0_10 = arith.constant 0 : index
    %c0_11 = arith.constant 0 : index
    %24 = vector.load %arg5[%c0_10, %c0_11] : memref<32x96xf32, #tpu.memory_space<vmem>>, vector<32x96xf32>
    %cst_12 = arith.constant dense<0.000000e+00> : vector<8x96xf32>
    %25 = tpu.matmul %23, %24, %cst_12 {dimension_numbers = #tpu.dot_dimension_numbers<[1], [0], [0], [1], [0, 0, 1, 1], [], []>} : vector<8x32xf32>, vector<32x96xf32>, vector<8x96xf32> -> vector<8x96xf32>
    %c0_13 = arith.constant 0 : index
    %c0_14 = arith.constant 0 : index
    %26 = vector.load %arg6[%c0_13, %c0_14] : memref<1x96xf32, #tpu.memory_space<vmem>>, vector<1x96xf32>
    %27 = vector.broadcast %26 : vector<1x96xf32> to vector<8x96xf32>
    %28 = arith.addf %25, %27 : vector<8x96xf32>
    %29 = vector.extract_strided_slice %28 {offsets = [0, 0], sizes = [8, 8], strides = [1, 1]} : vector<8x96xf32> to vector<8x8xf32>
    %c0_15 = arith.constant 0 : index
    %c0_16 = arith.constant 0 : index
    %c0_17 = arith.constant 0 : index
    %c0_18 = arith.constant 0 : index
    %30 = vector.load %arg7[%c0_15, %c0_16, %c0_17, %c0_18] : memref<1x4x8x8xf32, #tpu.memory_space<vmem>>, vector<1x1x8x8xf32>
    %31 = vector.shape_cast %30 : vector<1x1x8x8xf32> to vector<8x8xf32>
    %32 = vector.shape_cast %29 : vector<8x8xf32> to vector<1x1x8x8xf32>
    tpu.vector_store %arg7[%c0_15, %c0_16, %c0_17, %c0_18], %32 {strides = array<i32>} : memref<1x4x8x8xf32, #tpu.memory_space<vmem>>, vector<1x1x8x8xf32>,
    %33 = vector.extract_strided_slice %28 {offsets = [0, 32], sizes = [8, 8], strides = [1, 1]} : vector<8x96xf32> to vector<8x8xf32>
    %34 = tpu.transpose %33, [1, 0] : vector<8x8xf32> -> vector<8x8xf32>
    %c0_19 = arith.constant 0 : index
    %c0_20 = arith.constant 0 : index
    %c0_21 = arith.constant 0 : index
    %c0_22 = arith.constant 0 : index
    %35 = vector.load %arg8[%c0_19, %c0_20, %c0_21, %c0_22] : memref<1x4x8x8xf32, #tpu.memory_space<vmem>>, vector<1x1x8x8xf32>
    %36 = vector.shape_cast %35 : vector<1x1x8x8xf32> to vector<8x8xf32>
    %37 = vector.shape_cast %34 : vector<8x8xf32> to vector<1x1x8x8xf32>
    tpu.vector_store %arg8[%c0_19, %c0_20, %c0_21, %c0_22], %37 {strides = array<i32>} : memref<1x4x8x8xf32, #tpu.memory_space<vmem>>, vector<1x1x8x8xf32>,
    %38 = vector.extract_strided_slice %28 {offsets = [0, 64], sizes = [8, 8], strides = [1, 1]} : vector<8x96xf32> to vector<8x8xf32>
    %c0_23 = arith.constant 0 : index
    %c0_24 = arith.constant 0 : index
    %c0_25 = arith.constant 0 : index
    %c0_26 = arith.constant 0 : index
    %39 = vector.load %arg9[%c0_23, %c0_24, %c0_25, %c0_26] : memref<1x4x8x8xf32, #tpu.memory_space<vmem>>, vector<1x1x8x8xf32>
    %40 = vector.shape_cast %39 : vector<1x1x8x8xf32> to vector<8x8xf32>
    %41 = vector.shape_cast %38 : vector<8x8xf32> to vector<1x1x8x8xf32>
    tpu.vector_store %arg9[%c0_23, %c0_24, %c0_25, %c0_26], %41 {strides = array<i32>} : memref<1x4x8x8xf32, #tpu.memory_space<vmem>>, vector<1x1x8x8xf32>,
    %42 = vector.extract_strided_slice %28 {offsets = [0, 8], sizes = [8, 8], strides = [1, 1]} : vector<8x96xf32> to vector<8x8xf32>
    %c0_27 = arith.constant 0 : index
    %c1 = arith.constant 1 : index
    %c0_28 = arith.constant 0 : index
    %c0_29 = arith.constant 0 : index
    %43 = vector.load %arg7[%c0_27, %c1, %c0_28, %c0_29] : memref<1x4x8x8xf32, #tpu.memory_space<vmem>>, vector<1x1x8x8xf32>
    %44 = vector.shape_cast %43 : vector<1x1x8x8xf32> to vector<8x8xf32>
    %45 = vector.shape_cast %42 : vector<8x8xf32> to vector<1x1x8x8xf32>
    tpu.vector_store %arg7[%c0_27, %c1, %c0_28, %c0_29], %45 {strides = array<i32>} : memref<1x4x8x8xf32, #tpu.memory_space<vmem>>, vector<1x1x8x8xf32>,
    %46 = vector.extract_strided_slice %28 {offsets = [0, 40], sizes = [8, 8], strides = [1, 1]} : vector<8x96xf32> to vector<8x8xf32>
    %47 = tpu.transpose %46, [1, 0] : vector<8x8xf32> -> vector<8x8xf32>
    %c0_30 = arith.constant 0 : index
    %c1_31 = arith.constant 1 : index
    %c0_32 = arith.constant 0 : index
    %c0_33 = arith.constant 0 : index
    %48 = vector.load %arg8[%c0_30, %c1_31, %c0_32, %c0_33] : memref<1x4x8x8xf32, #tpu.memory_space<vmem>>, vector<1x1x8x8xf32>
    %49 = vector.shape_cast %48 : vector<1x1x8x8xf32> to vector<8x8xf32>
    %50 = vector.shape_cast %47 : vector<8x8xf32> to vector<1x1x8x8xf32>
    tpu.vector_store %arg8[%c0_30, %c1_31, %c0_32, %c0_33], %50 {strides = array<i32>} : memref<1x4x8x8xf32, #tpu.memory_space<vmem>>, vector<1x1x8x8xf32>,
    %51 = vector.extract_strided_slice %28 {offsets = [0, 72], sizes = [8, 8], strides = [1, 1]} : vector<8x96xf32> to vector<8x8xf32>
    %c0_34 = arith.constant 0 : index
    %c1_35 = arith.constant 1 : index
    %c0_36 = arith.constant 0 : index
    %c0_37 = arith.constant 0 : index
    %52 = vector.load %arg9[%c0_34, %c1_35, %c0_36, %c0_37] : memref<1x4x8x8xf32, #tpu.memory_space<vmem>>, vector<1x1x8x8xf32>
    %53 = vector.shape_cast %52 : vector<1x1x8x8xf32> to vector<8x8xf32>
    %54 = vector.shape_cast %51 : vector<8x8xf32> to vector<1x1x8x8xf32>
    tpu.vector_store %arg9[%c0_34, %c1_35, %c0_36, %c0_37], %54 {strides = array<i32>} : memref<1x4x8x8xf32, #tpu.memory_space<vmem>>, vector<1x1x8x8xf32>,
    %55 = vector.extract_strided_slice %28 {offsets = [0, 16], sizes = [8, 8], strides = [1, 1]} : vector<8x96xf32> to vector<8x8xf32>
    %c0_38 = arith.constant 0 : index
    %c2 = arith.constant 2 : index
    %c0_39 = arith.constant 0 : index
    %c0_40 = arith.constant 0 : index
    %56 = vector.load %arg7[%c0_38, %c2, %c0_39, %c0_40] : memref<1x4x8x8xf32, #tpu.memory_space<vmem>>, vector<1x1x8x8xf32>
    %57 = vector.shape_cast %56 : vector<1x1x8x8xf32> to vector<8x8xf32>
    %58 = vector.shape_cast %55 : vector<8x8xf32> to vector<1x1x8x8xf32>
    tpu.vector_store %arg7[%c0_38, %c2, %c0_39, %c0_40], %58 {strides = array<i32>} : memref<1x4x8x8xf32, #tpu.memory_space<vmem>>, vector<1x1x8x8xf32>,
    %59 = vector.extract_strided_slice %28 {offsets = [0, 48], sizes = [8, 8], strides = [1, 1]} : vector<8x96xf32> to vector<8x8xf32>
    %60 = tpu.transpose %59, [1, 0] : vector<8x8xf32> -> vector<8x8xf32>
    %c0_41 = arith.constant 0 : index
    %c2_42 = arith.constant 2 : index
    %c0_43 = arith.constant 0 : index
    %c0_44 = arith.constant 0 : index
    %61 = vector.load %arg8[%c0_41, %c2_42, %c0_43, %c0_44] : memref<1x4x8x8xf32, #tpu.memory_space<vmem>>, vector<1x1x8x8xf32>
    %62 = vector.shape_cast %61 : vector<1x1x8x8xf32> to vector<8x8xf32>
    %63 = vector.shape_cast %60 : vector<8x8xf32> to vector<1x1x8x8xf32>
    tpu.vector_store %arg8[%c0_41, %c2_42, %c0_43, %c0_44], %63 {strides = array<i32>} : memref<1x4x8x8xf32, #tpu.memory_space<vmem>>, vector<1x1x8x8xf32>,
    %64 = vector.extract_strided_slice %28 {offsets = [0, 80], sizes = [8, 8], strides = [1, 1]} : vector<8x96xf32> to vector<8x8xf32>
    %c0_45 = arith.constant 0 : index
    %c2_46 = arith.constant 2 : index
    %c0_47 = arith.constant 0 : index
    %c0_48 = arith.constant 0 : index
    %65 = vector.load %arg9[%c0_45, %c2_46, %c0_47, %c0_48] : memref<1x4x8x8xf32, #tpu.memory_space<vmem>>, vector<1x1x8x8xf32>
    %66 = vector.shape_cast %65 : vector<1x1x8x8xf32> to vector<8x8xf32>
    %67 = vector.shape_cast %64 : vector<8x8xf32> to vector<1x1x8x8xf32>
    tpu.vector_store %arg9[%c0_45, %c2_46, %c0_47, %c0_48], %67 {strides = array<i32>} : memref<1x4x8x8xf32, #tpu.memory_space<vmem>>, vector<1x1x8x8xf32>,
    %68 = vector.extract_strided_slice %28 {offsets = [0, 24], sizes = [8, 8], strides = [1, 1]} : vector<8x96xf32> to vector<8x8xf32>
    %c0_49 = arith.constant 0 : index
    %c3 = arith.constant 3 : index
    %c0_50 = arith.constant 0 : index
    %c0_51 = arith.constant 0 : index
    %69 = vector.load %arg7[%c0_49, %c3, %c0_50, %c0_51] : memref<1x4x8x8xf32, #tpu.memory_space<vmem>>, vector<1x1x8x8xf32>
    %70 = vector.shape_cast %69 : vector<1x1x8x8xf32> to vector<8x8xf32>
    %71 = vector.shape_cast %68 : vector<8x8xf32> to vector<1x1x8x8xf32>
    tpu.vector_store %arg7[%c0_49, %c3, %c0_50, %c0_51], %71 {strides = array<i32>} : memref<1x4x8x8xf32, #tpu.memory_space<vmem>>, vector<1x1x8x8xf32>,
    %72 = vector.extract_strided_slice %28 {offsets = [0, 56], sizes = [8, 8], strides = [1, 1]} : vector<8x96xf32> to vector<8x8xf32>
    %73 = tpu.transpose %72, [1, 0] : vector<8x8xf32> -> vector<8x8xf32>
    %c0_52 = arith.constant 0 : index
    %c3_53 = arith.constant 3 : index
    %c0_54 = arith.constant 0 : index
    %c0_55 = arith.constant 0 : index
    %74 = vector.load %arg8[%c0_52, %c3_53, %c0_54, %c0_55] : memref<1x4x8x8xf32, #tpu.memory_space<vmem>>, vector<1x1x8x8xf32>
    %75 = vector.shape_cast %74 : vector<1x1x8x8xf32> to vector<8x8xf32>
    %76 = vector.shape_cast %73 : vector<8x8xf32> to vector<1x1x8x8xf32>
    tpu.vector_store %arg8[%c0_52, %c3_53, %c0_54, %c0_55], %76 {strides = array<i32>} : memref<1x4x8x8xf32, #tpu.memory_space<vmem>>, vector<1x1x8x8xf32>,
    %77 = vector.extract_strided_slice %28 {offsets = [0, 88], sizes = [8, 8], strides = [1, 1]} : vector<8x96xf32> to vector<8x8xf32>
    %c0_56 = arith.constant 0 : index
    %c3_57 = arith.constant 3 : index
    %c0_58 = arith.constant 0 : index
    %c0_59 = arith.constant 0 : index
    %78 = vector.load %arg9[%c0_56, %c3_57, %c0_58, %c0_59] : memref<1x4x8x8xf32, #tpu.memory_space<vmem>>, vector<1x1x8x8xf32>
    %79 = vector.shape_cast %78 : vector<1x1x8x8xf32> to vector<8x8xf32>
    %80 = vector.shape_cast %77 : vector<8x8xf32> to vector<1x1x8x8xf32>
    tpu.vector_store %arg9[%c0_56, %c3_57, %c0_58, %c0_59], %80 {strides = array<i32>} : memref<1x4x8x8xf32, #tpu.memory_space<vmem>>, vector<1x1x8x8xf32>,
    return
  }
  func.func @transform_0(%arg0: i32, %arg1: i32) -> (i32, i32, i32) {
    %c0_i32 = arith.constant 0 : i32
    %c0_i32_0 = arith.constant 0 : i32
    return %arg0, %arg1, %c0_i32 : i32, i32, i32
  }
  func.func @transform_1(%arg0: i32, %arg1: i32) -> (i32, i32) {
    %c0_i32 = arith.constant 0 : i32
    %c0_i32_0 = arith.constant 0 : i32
    %c0_i32_1 = arith.constant 0 : i32
    return %c0_i32, %c0_i32_0 : i32, i32
  }
  func.func @transform_2(%arg0: i32, %arg1: i32) -> (i32, i32) {
    %c0_i32 = arith.constant 0 : i32
    %c0_i32_0 = arith.constant 0 : i32
    %c0_i32_1 = arith.constant 0 : i32
    return %c0_i32, %c0_i32_0 : i32, i32
  }
  func.func @transform_3(%arg0: i32, %arg1: i32) -> (i32, i32) {
    %c0_i32 = arith.constant 0 : i32
    %c0_i32_0 = arith.constant 0 : i32
    %c0_i32_1 = arith.constant 0 : i32
    return %c0_i32, %c0_i32_0 : i32, i32
  }
  func.func @transform_4(%arg0: i32, %arg1: i32) -> (i32, i32) {
    %c0_i32 = arith.constant 0 : i32
    %c0_i32_0 = arith.constant 0 : i32
    %c0_i32_1 = arith.constant 0 : i32
    return %c0_i32, %c0_i32_0 : i32, i32
  }
  func.func @transform_5(%arg0: i32, %arg1: i32) -> (i32, i32, i32, i32) {
    %c0_i32 = arith.constant 0 : i32
    %c0_i32_0 = arith.constant 0 : i32
    %c0_i32_1 = arith.constant 0 : i32
    return %arg0, %c0_i32, %arg1, %c0_i32_0 : i32, i32, i32, i32
  }
  func.func @transform_6(%arg0: i32, %arg1: i32) -> (i32, i32, i32, i32) {
    %c0_i32 = arith.constant 0 : i32
    %c0_i32_0 = arith.constant 0 : i32
    %c0_i32_1 = arith.constant 0 : i32
    return %arg0, %c0_i32, %c0_i32_0, %arg1 : i32, i32, i32, i32
  }
  func.func @transform_7(%arg0: i32, %arg1: i32) -> (i32, i32, i32, i32) {
    %c0_i32 = arith.constant 0 : i32
    %c0_i32_0 = arith.constant 0 : i32
    %c0_i32_1 = arith.constant 0 : i32
    return %arg0, %c0_i32, %arg1, %c0_i32_0 : i32, i32, i32, i32
  }
}

module attributes {stable_mosaic.version = 11 : i64} {
  func.func @_attn_ffn_kernel(%arg0: i32, %arg1: i32, %arg2: memref<1x8x32xf32, #tpu.memory_space<vmem>>, %arg3: memref<1x4x8x8xf32, #tpu.memory_space<vmem>>, %arg4: memref<1x4x8x8xf32, #tpu.memory_space<vmem>>, %arg5: memref<1x4x8x8xf32, #tpu.memory_space<vmem>>, %arg6: memref<32x32xf32, #tpu.memory_space<vmem>>, %arg7: memref<1x32xf32, #tpu.memory_space<vmem>>, %arg8: memref<1x32xf32, #tpu.memory_space<vmem>>, %arg9: memref<1x32xf32, #tpu.memory_space<vmem>>, %arg10: memref<32x64xf32, #tpu.memory_space<vmem>>, %arg11: memref<1x64xf32, #tpu.memory_space<vmem>>, %arg12: memref<64x32xf32, #tpu.memory_space<vmem>>, %arg13: memref<1x32xf32, #tpu.memory_space<vmem>>, %arg14: memref<1x8x32xf32, #tpu.memory_space<vmem>>) attributes {dimension_semantics = [#tpu.dimension_semantics<parallel>, #tpu.dimension_semantics<parallel>], iteration_bounds = array<i64: 2, 1>, scalar_prefetch = 0 : i64, scratch_operands = 0 : i64, tpu.core_type = #tpu.core_type<tc>, window_params = [{transform_indices = @transform_0, window_bounds = array<i64: 1, 8, 32>}, {transform_indices = @transform_1, window_bounds = array<i64: 1, 4, 8, 8>}, {pipeline_mode = #tpu.pipeline_mode<synchronous>, transform_indices = @transform_2, window_bounds = array<i64: 1, 4, 8, 8>}, {pipeline_mode = #tpu.pipeline_mode<synchronous>, transform_indices = @transform_3, window_bounds = array<i64: 1, 4, 8, 8>}, {pipeline_mode = #tpu.pipeline_mode<synchronous>, transform_indices = @transform_4, window_bounds = array<i64: 32, 32>}, {pipeline_mode = #tpu.pipeline_mode<synchronous>, transform_indices = @transform_5, window_bounds = array<i64: 1, 32>}, {pipeline_mode = #tpu.pipeline_mode<synchronous>, transform_indices = @transform_6, window_bounds = array<i64: 1, 32>}, {pipeline_mode = #tpu.pipeline_mode<synchronous>, transform_indices = @transform_7, window_bounds = array<i64: 1, 32>}, {pipeline_mode = #tpu.pipeline_mode<synchronous>, transform_indices = @transform_8, window_bounds = array<i64: 32, 64>}, {pipeline_mode = #tpu.pipeline_mode<synchronous>, transform_indices = @transform_9, window_bounds = array<i64: 1, 64>}, {pipeline_mode = #tpu.pipeline_mode<synchronous>, transform_indices = @transform_10, window_bounds = array<i64: 64, 32>}, {pipeline_mode = #tpu.pipeline_mode<synchronous>, transform_indices = @transform_11, window_bounds = array<i64: 1, 32>}, {transform_indices = @transform_12, window_bounds = array<i64: 1, 8, 32>}]} {
    %c0 = arith.constant 0 : index
    %c0_0 = arith.constant 0 : index
    %c0_1 = arith.constant 0 : index
    %c0_2 = arith.constant 0 : index
    %0 = vector.load %arg3[%c0, %c0_0, %c0_1, %c0_2] : memref<1x4x8x8xf32, #tpu.memory_space<vmem>>, vector<1x1x8x8xf32>
    %1 = vector.shape_cast %0 : vector<1x1x8x8xf32> to vector<8x8xf32>
    %c0_3 = arith.constant 0 : index
    %c0_4 = arith.constant 0 : index
    %c0_5 = arith.constant 0 : index
    %c0_6 = arith.constant 0 : index
    %2 = vector.load %arg4[%c0_3, %c0_4, %c0_5, %c0_6] : memref<1x4x8x8xf32, #tpu.memory_space<vmem>>, vector<1x1x8x8xf32>
    %3 = vector.shape_cast %2 : vector<1x1x8x8xf32> to vector<8x8xf32>
    %cst = arith.constant dense<0.000000e+00> : vector<8x8xf32>
    %4 = tpu.matmul %1, %3, %cst {dimension_numbers = #tpu.dot_dimension_numbers<[1], [0], [0], [1], [0, 0, 1, 1], [], []>} : vector<8x8xf32>, vector<8x8xf32>, vector<8x8xf32> -> vector<8x8xf32>
    %cst_7 = arith.constant dense<0xFF800000> : vector<8xf32>
    %5 = vector.multi_reduction <maximumf>, %4, %cst_7 [1] : vector<8x8xf32> to vector<8xf32>
    %6 = vector.shape_cast %5 : vector<8xf32> to vector<8x1xf32>
    %7 = vector.broadcast %6 : vector<8x1xf32> to vector<8x8xf32>
    %8 = arith.subf %4, %7 : vector<8x8xf32>
    %9 = math.exp %8 : vector<8x8xf32>
    %cst_8 = arith.constant dense<0.000000e+00> : vector<8xf32>
    %10 = vector.multi_reduction <add>, %9, %cst_8 [1] : vector<8x8xf32> to vector<8xf32>
    %11 = vector.shape_cast %10 : vector<8xf32> to vector<8x1xf32>
    %12 = tpu.reciprocal %11 : vector<8x1xf32> -> vector<8x1xf32>
    %13 = vector.broadcast %12 : vector<8x1xf32> to vector<8x8xf32>
    %14 = arith.mulf %9, %13 : vector<8x8xf32>
    %c0_9 = arith.constant 0 : index
    %c0_10 = arith.constant 0 : index
    %c0_11 = arith.constant 0 : index
    %c0_12 = arith.constant 0 : index
    %15 = vector.load %arg5[%c0_9, %c0_10, %c0_11, %c0_12] : memref<1x4x8x8xf32, #tpu.memory_space<vmem>>, vector<1x1x8x8xf32>
    %16 = vector.shape_cast %15 : vector<1x1x8x8xf32> to vector<8x8xf32>
    %cst_13 = arith.constant dense<0.000000e+00> : vector<8x8xf32>
    %17 = tpu.matmul %14, %16, %cst_13 {dimension_numbers = #tpu.dot_dimension_numbers<[1], [0], [0], [1], [0, 0, 1, 1], [], []>} : vector<8x8xf32>, vector<8x8xf32>, vector<8x8xf32> -> vector<8x8xf32>
    %c0_14 = arith.constant 0 : index
    %c0_15 = arith.constant 0 : index
    %18 = vector.load %arg6[%c0_14, %c0_15] : memref<32x32xf32, #tpu.memory_space<vmem>>, vector<8x32xf32>
    %cst_16 = arith.constant dense<0.000000e+00> : vector<8x32xf32>
    %19 = tpu.matmul %17, %18, %cst_16 {dimension_numbers = #tpu.dot_dimension_numbers<[1], [0], [0], [1], [0, 0, 1, 1], [], []>} : vector<8x8xf32>, vector<8x32xf32>, vector<8x32xf32> -> vector<8x32xf32>
    %c0_17 = arith.constant 0 : index
    %c1 = arith.constant 1 : index
    %c0_18 = arith.constant 0 : index
    %c0_19 = arith.constant 0 : index
    %20 = vector.load %arg3[%c0_17, %c1, %c0_18, %c0_19] : memref<1x4x8x8xf32, #tpu.memory_space<vmem>>, vector<1x1x8x8xf32>
    %21 = vector.shape_cast %20 : vector<1x1x8x8xf32> to vector<8x8xf32>
    %c0_20 = arith.constant 0 : index
    %c1_21 = arith.constant 1 : index
    %c0_22 = arith.constant 0 : index
    %c0_23 = arith.constant 0 : index
    %22 = vector.load %arg4[%c0_20, %c1_21, %c0_22, %c0_23] : memref<1x4x8x8xf32, #tpu.memory_space<vmem>>, vector<1x1x8x8xf32>
    %23 = vector.shape_cast %22 : vector<1x1x8x8xf32> to vector<8x8xf32>
    %cst_24 = arith.constant dense<0.000000e+00> : vector<8x8xf32>
    %24 = tpu.matmul %21, %23, %cst_24 {dimension_numbers = #tpu.dot_dimension_numbers<[1], [0], [0], [1], [0, 0, 1, 1], [], []>} : vector<8x8xf32>, vector<8x8xf32>, vector<8x8xf32> -> vector<8x8xf32>
    %cst_25 = arith.constant dense<0xFF800000> : vector<8xf32>
    %25 = vector.multi_reduction <maximumf>, %24, %cst_25 [1] : vector<8x8xf32> to vector<8xf32>
    %26 = vector.shape_cast %25 : vector<8xf32> to vector<8x1xf32>
    %27 = vector.broadcast %26 : vector<8x1xf32> to vector<8x8xf32>
    %28 = arith.subf %24, %27 : vector<8x8xf32>
    %29 = math.exp %28 : vector<8x8xf32>
    %cst_26 = arith.constant dense<0.000000e+00> : vector<8xf32>
    %30 = vector.multi_reduction <add>, %29, %cst_26 [1] : vector<8x8xf32> to vector<8xf32>
    %31 = vector.shape_cast %30 : vector<8xf32> to vector<8x1xf32>
    %32 = tpu.reciprocal %31 : vector<8x1xf32> -> vector<8x1xf32>
    %33 = vector.broadcast %32 : vector<8x1xf32> to vector<8x8xf32>
    %34 = arith.mulf %29, %33 : vector<8x8xf32>
    %c0_27 = arith.constant 0 : index
    %c1_28 = arith.constant 1 : index
    %c0_29 = arith.constant 0 : index
    %c0_30 = arith.constant 0 : index
    %35 = vector.load %arg5[%c0_27, %c1_28, %c0_29, %c0_30] : memref<1x4x8x8xf32, #tpu.memory_space<vmem>>, vector<1x1x8x8xf32>
    %36 = vector.shape_cast %35 : vector<1x1x8x8xf32> to vector<8x8xf32>
    %cst_31 = arith.constant dense<0.000000e+00> : vector<8x8xf32>
    %37 = tpu.matmul %34, %36, %cst_31 {dimension_numbers = #tpu.dot_dimension_numbers<[1], [0], [0], [1], [0, 0, 1, 1], [], []>} : vector<8x8xf32>, vector<8x8xf32>, vector<8x8xf32> -> vector<8x8xf32>
    %c8 = arith.constant 8 : index
    %c0_32 = arith.constant 0 : index
    %38 = vector.load %arg6[%c8, %c0_32] : memref<32x32xf32, #tpu.memory_space<vmem>>, vector<8x32xf32>
    %cst_33 = arith.constant dense<0.000000e+00> : vector<8x32xf32>
    %39 = tpu.matmul %37, %38, %cst_33 {dimension_numbers = #tpu.dot_dimension_numbers<[1], [0], [0], [1], [0, 0, 1, 1], [], []>} : vector<8x8xf32>, vector<8x32xf32>, vector<8x32xf32> -> vector<8x32xf32>
    %40 = arith.addf %19, %39 : vector<8x32xf32>
    %c0_34 = arith.constant 0 : index
    %c2 = arith.constant 2 : index
    %c0_35 = arith.constant 0 : index
    %c0_36 = arith.constant 0 : index
    %41 = vector.load %arg3[%c0_34, %c2, %c0_35, %c0_36] : memref<1x4x8x8xf32, #tpu.memory_space<vmem>>, vector<1x1x8x8xf32>
    %42 = vector.shape_cast %41 : vector<1x1x8x8xf32> to vector<8x8xf32>
    %c0_37 = arith.constant 0 : index
    %c2_38 = arith.constant 2 : index
    %c0_39 = arith.constant 0 : index
    %c0_40 = arith.constant 0 : index
    %43 = vector.load %arg4[%c0_37, %c2_38, %c0_39, %c0_40] : memref<1x4x8x8xf32, #tpu.memory_space<vmem>>, vector<1x1x8x8xf32>
    %44 = vector.shape_cast %43 : vector<1x1x8x8xf32> to vector<8x8xf32>
    %cst_41 = arith.constant dense<0.000000e+00> : vector<8x8xf32>
    %45 = tpu.matmul %42, %44, %cst_41 {dimension_numbers = #tpu.dot_dimension_numbers<[1], [0], [0], [1], [0, 0, 1, 1], [], []>} : vector<8x8xf32>, vector<8x8xf32>, vector<8x8xf32> -> vector<8x8xf32>
    %cst_42 = arith.constant dense<0xFF800000> : vector<8xf32>
    %46 = vector.multi_reduction <maximumf>, %45, %cst_42 [1] : vector<8x8xf32> to vector<8xf32>
    %47 = vector.shape_cast %46 : vector<8xf32> to vector<8x1xf32>
    %48 = vector.broadcast %47 : vector<8x1xf32> to vector<8x8xf32>
    %49 = arith.subf %45, %48 : vector<8x8xf32>
    %50 = math.exp %49 : vector<8x8xf32>
    %cst_43 = arith.constant dense<0.000000e+00> : vector<8xf32>
    %51 = vector.multi_reduction <add>, %50, %cst_43 [1] : vector<8x8xf32> to vector<8xf32>
    %52 = vector.shape_cast %51 : vector<8xf32> to vector<8x1xf32>
    %53 = tpu.reciprocal %52 : vector<8x1xf32> -> vector<8x1xf32>
    %54 = vector.broadcast %53 : vector<8x1xf32> to vector<8x8xf32>
    %55 = arith.mulf %50, %54 : vector<8x8xf32>
    %c0_44 = arith.constant 0 : index
    %c2_45 = arith.constant 2 : index
    %c0_46 = arith.constant 0 : index
    %c0_47 = arith.constant 0 : index
    %56 = vector.load %arg5[%c0_44, %c2_45, %c0_46, %c0_47] : memref<1x4x8x8xf32, #tpu.memory_space<vmem>>, vector<1x1x8x8xf32>
    %57 = vector.shape_cast %56 : vector<1x1x8x8xf32> to vector<8x8xf32>
    %cst_48 = arith.constant dense<0.000000e+00> : vector<8x8xf32>
    %58 = tpu.matmul %55, %57, %cst_48 {dimension_numbers = #tpu.dot_dimension_numbers<[1], [0], [0], [1], [0, 0, 1, 1], [], []>} : vector<8x8xf32>, vector<8x8xf32>, vector<8x8xf32> -> vector<8x8xf32>
    %c16 = arith.constant 16 : index
    %c0_49 = arith.constant 0 : index
    %59 = vector.load %arg6[%c16, %c0_49] : memref<32x32xf32, #tpu.memory_space<vmem>>, vector<8x32xf32>
    %cst_50 = arith.constant dense<0.000000e+00> : vector<8x32xf32>
    %60 = tpu.matmul %58, %59, %cst_50 {dimension_numbers = #tpu.dot_dimension_numbers<[1], [0], [0], [1], [0, 0, 1, 1], [], []>} : vector<8x8xf32>, vector<8x32xf32>, vector<8x32xf32> -> vector<8x32xf32>
    %61 = arith.addf %40, %60 : vector<8x32xf32>
    %c0_51 = arith.constant 0 : index
    %c3 = arith.constant 3 : index
    %c0_52 = arith.constant 0 : index
    %c0_53 = arith.constant 0 : index
    %62 = vector.load %arg3[%c0_51, %c3, %c0_52, %c0_53] : memref<1x4x8x8xf32, #tpu.memory_space<vmem>>, vector<1x1x8x8xf32>
    %63 = vector.shape_cast %62 : vector<1x1x8x8xf32> to vector<8x8xf32>
    %c0_54 = arith.constant 0 : index
    %c3_55 = arith.constant 3 : index
    %c0_56 = arith.constant 0 : index
    %c0_57 = arith.constant 0 : index
    %64 = vector.load %arg4[%c0_54, %c3_55, %c0_56, %c0_57] : memref<1x4x8x8xf32, #tpu.memory_space<vmem>>, vector<1x1x8x8xf32>
    %65 = vector.shape_cast %64 : vector<1x1x8x8xf32> to vector<8x8xf32>
    %cst_58 = arith.constant dense<0.000000e+00> : vector<8x8xf32>
    %66 = tpu.matmul %63, %65, %cst_58 {dimension_numbers = #tpu.dot_dimension_numbers<[1], [0], [0], [1], [0, 0, 1, 1], [], []>} : vector<8x8xf32>, vector<8x8xf32>, vector<8x8xf32> -> vector<8x8xf32>
    %cst_59 = arith.constant dense<0xFF800000> : vector<8xf32>
    %67 = vector.multi_reduction <maximumf>, %66, %cst_59 [1] : vector<8x8xf32> to vector<8xf32>
    %68 = vector.shape_cast %67 : vector<8xf32> to vector<8x1xf32>
    %69 = vector.broadcast %68 : vector<8x1xf32> to vector<8x8xf32>
    %70 = arith.subf %66, %69 : vector<8x8xf32>
    %71 = math.exp %70 : vector<8x8xf32>
    %cst_60 = arith.constant dense<0.000000e+00> : vector<8xf32>
    %72 = vector.multi_reduction <add>, %71, %cst_60 [1] : vector<8x8xf32> to vector<8xf32>
    %73 = vector.shape_cast %72 : vector<8xf32> to vector<8x1xf32>
    %74 = tpu.reciprocal %73 : vector<8x1xf32> -> vector<8x1xf32>
    %75 = vector.broadcast %74 : vector<8x1xf32> to vector<8x8xf32>
    %76 = arith.mulf %71, %75 : vector<8x8xf32>
    %c0_61 = arith.constant 0 : index
    %c3_62 = arith.constant 3 : index
    %c0_63 = arith.constant 0 : index
    %c0_64 = arith.constant 0 : index
    %77 = vector.load %arg5[%c0_61, %c3_62, %c0_63, %c0_64] : memref<1x4x8x8xf32, #tpu.memory_space<vmem>>, vector<1x1x8x8xf32>
    %78 = vector.shape_cast %77 : vector<1x1x8x8xf32> to vector<8x8xf32>
    %cst_65 = arith.constant dense<0.000000e+00> : vector<8x8xf32>
    %79 = tpu.matmul %76, %78, %cst_65 {dimension_numbers = #tpu.dot_dimension_numbers<[1], [0], [0], [1], [0, 0, 1, 1], [], []>} : vector<8x8xf32>, vector<8x8xf32>, vector<8x8xf32> -> vector<8x8xf32>
    %c24 = arith.constant 24 : index
    %c0_66 = arith.constant 0 : index
    %80 = vector.load %arg6[%c24, %c0_66] : memref<32x32xf32, #tpu.memory_space<vmem>>, vector<8x32xf32>
    %cst_67 = arith.constant dense<0.000000e+00> : vector<8x32xf32>
    %81 = tpu.matmul %79, %80, %cst_67 {dimension_numbers = #tpu.dot_dimension_numbers<[1], [0], [0], [1], [0, 0, 1, 1], [], []>} : vector<8x8xf32>, vector<8x32xf32>, vector<8x32xf32> -> vector<8x32xf32>
    %82 = arith.addf %61, %81 : vector<8x32xf32>
    %c0_68 = arith.constant 0 : index
    %c0_69 = arith.constant 0 : index
    %c0_70 = arith.constant 0 : index
    %83 = vector.load %arg2[%c0_68, %c0_69, %c0_70] : memref<1x8x32xf32, #tpu.memory_space<vmem>>, vector<1x8x32xf32>
    %84 = vector.shape_cast %83 : vector<1x8x32xf32> to vector<8x32xf32>
    %85 = arith.addf %84, %82 : vector<8x32xf32>
    %c0_71 = arith.constant 0 : index
    %c0_72 = arith.constant 0 : index
    %86 = vector.load %arg7[%c0_71, %c0_72] : memref<1x32xf32, #tpu.memory_space<vmem>>, vector<1x32xf32>
    %87 = vector.broadcast %86 : vector<1x32xf32> to vector<8x32xf32>
    %88 = arith.addf %85, %87 : vector<8x32xf32>
    %c0_73 = arith.constant 0 : index
    %c0_74 = arith.constant 0 : index
    %89 = vector.load %arg8[%c0_73, %c0_74] : memref<1x32xf32, #tpu.memory_space<vmem>>, vector<1x32xf32>
    %c0_75 = arith.constant 0 : index
    %c0_76 = arith.constant 0 : index
    %90 = vector.load %arg9[%c0_75, %c0_76] : memref<1x32xf32, #tpu.memory_space<vmem>>, vector<1x32xf32>
    %cst_77 = arith.constant dense<0.000000e+00> : vector<8xf32>
    %91 = vector.multi_reduction <add>, %88, %cst_77 [1] : vector<8x32xf32> to vector<8xf32>
    %92 = vector.shape_cast %91 : vector<8xf32> to vector<8x1xf32>
    %cst_78 = arith.constant 3.200000e+01 : f32
    %93 = vector.broadcast %cst_78 : f32 to vector<8x1xf32>
    %94 = arith.divf %92, %93 : vector<8x1xf32>
    %95 = vector.broadcast %94 : vector<8x1xf32> to vector<8x32xf32>
    %96 = arith.subf %88, %95 : vector<8x32xf32>
    %97 = arith.mulf %96, %96 : vector<8x32xf32>
    %cst_79 = arith.constant dense<0.000000e+00> : vector<8xf32>
    %98 = vector.multi_reduction <add>, %97, %cst_79 [1] : vector<8x32xf32> to vector<8xf32>
    %99 = vector.shape_cast %98 : vector<8xf32> to vector<8x1xf32>
    %cst_80 = arith.constant 3.200000e+01 : f32
    %100 = vector.broadcast %cst_80 : f32 to vector<8x1xf32>
    %101 = arith.divf %99, %100 : vector<8x1xf32>
    %cst_81 = arith.constant 9.99999974E-6 : f32
    %102 = vector.broadcast %cst_81 : f32 to vector<8x1xf32>
    %103 = arith.addf %101, %102 : vector<8x1xf32>
    %104 = math.rsqrt %103 : vector<8x1xf32>
    %105 = vector.broadcast %104 : vector<8x1xf32> to vector<8x32xf32>
    %106 = arith.mulf %96, %105 : vector<8x32xf32>
    %107 = vector.broadcast %89 : vector<1x32xf32> to vector<8x32xf32>
    %108 = arith.mulf %106, %107 : vector<8x32xf32>
    %109 = vector.broadcast %90 : vector<1x32xf32> to vector<8x32xf32>
    %110 = arith.addf %108, %109 : vector<8x32xf32>
    %c0_82 = arith.constant 0 : index
    %c0_83 = arith.constant 0 : index
    %111 = vector.load %arg10[%c0_82, %c0_83] : memref<32x64xf32, #tpu.memory_space<vmem>>, vector<32x64xf32>
    %cst_84 = arith.constant dense<0.000000e+00> : vector<8x64xf32>
    %112 = tpu.matmul %110, %111, %cst_84 {dimension_numbers = #tpu.dot_dimension_numbers<[1], [0], [0], [1], [0, 0, 1, 1], [], []>} : vector<8x32xf32>, vector<32x64xf32>, vector<8x64xf32> -> vector<8x64xf32>
    %c0_85 = arith.constant 0 : index
    %c0_86 = arith.constant 0 : index
    %113 = vector.load %arg11[%c0_85, %c0_86] : memref<1x64xf32, #tpu.memory_space<vmem>>, vector<1x64xf32>
    %114 = vector.broadcast %113 : vector<1x64xf32> to vector<8x64xf32>
    %115 = arith.addf %112, %114 : vector<8x64xf32>
    %cst_87 = arith.constant 0.000000e+00 : f32
    %116 = vector.broadcast %cst_87 : f32 to vector<8x64xf32>
    %117 = arith.maximumf %115, %116 : vector<8x64xf32>
    %c0_88 = arith.constant 0 : index
    %c0_89 = arith.constant 0 : index
    %118 = vector.load %arg12[%c0_88, %c0_89] : memref<64x32xf32, #tpu.memory_space<vmem>>, vector<64x32xf32>
    %cst_90 = arith.constant dense<0.000000e+00> : vector<8x32xf32>
    %119 = tpu.matmul %117, %118, %cst_90 {dimension_numbers = #tpu.dot_dimension_numbers<[1], [0], [0], [1], [0, 0, 1, 1], [], []>} : vector<8x64xf32>, vector<64x32xf32>, vector<8x32xf32> -> vector<8x32xf32>
    %c0_91 = arith.constant 0 : index
    %c0_92 = arith.constant 0 : index
    %120 = vector.load %arg13[%c0_91, %c0_92] : memref<1x32xf32, #tpu.memory_space<vmem>>, vector<1x32xf32>
    %121 = vector.broadcast %120 : vector<1x32xf32> to vector<8x32xf32>
    %122 = arith.addf %119, %121 : vector<8x32xf32>
    %123 = arith.addf %88, %122 : vector<8x32xf32>
    %c0_93 = arith.constant 0 : index
    %c0_94 = arith.constant 0 : index
    %c0_95 = arith.constant 0 : index
    %124 = vector.load %arg14[%c0_93, %c0_94, %c0_95] : memref<1x8x32xf32, #tpu.memory_space<vmem>>, vector<1x8x32xf32>
    %125 = vector.shape_cast %124 : vector<1x8x32xf32> to vector<8x32xf32>
    %126 = vector.shape_cast %123 : vector<8x32xf32> to vector<1x8x32xf32>
    tpu.vector_store %arg14[%c0_93, %c0_94, %c0_95], %126 {strides = array<i32>} : memref<1x8x32xf32, #tpu.memory_space<vmem>>, vector<1x8x32xf32>,
    return
  }
  func.func @transform_0(%arg0: i32, %arg1: i32) -> (i32, i32, i32) {
    %c0_i32 = arith.constant 0 : i32
    %c0_i32_0 = arith.constant 0 : i32
    return %arg0, %arg1, %c0_i32 : i32, i32, i32
  }
  func.func @transform_1(%arg0: i32, %arg1: i32) -> (i32, i32, i32, i32) {
    %c0_i32 = arith.constant 0 : i32
    %c0_i32_0 = arith.constant 0 : i32
    %c0_i32_1 = arith.constant 0 : i32
    return %arg0, %c0_i32, %arg1, %c0_i32_0 : i32, i32, i32, i32
  }
  func.func @transform_2(%arg0: i32, %arg1: i32) -> (i32, i32, i32, i32) {
    %c0_i32 = arith.constant 0 : i32
    %c0_i32_0 = arith.constant 0 : i32
    %c0_i32_1 = arith.constant 0 : i32
    %c0_i32_2 = arith.constant 0 : i32
    return %arg0, %c0_i32, %c0_i32_0, %c0_i32_1 : i32, i32, i32, i32
  }
  func.func @transform_3(%arg0: i32, %arg1: i32) -> (i32, i32, i32, i32) {
    %c0_i32 = arith.constant 0 : i32
    %c0_i32_0 = arith.constant 0 : i32
    %c0_i32_1 = arith.constant 0 : i32
    %c0_i32_2 = arith.constant 0 : i32
    return %arg0, %c0_i32, %c0_i32_0, %c0_i32_1 : i32, i32, i32, i32
  }
  func.func @transform_4(%arg0: i32, %arg1: i32) -> (i32, i32) {
    %c0_i32 = arith.constant 0 : i32
    %c0_i32_0 = arith.constant 0 : i32
    %c0_i32_1 = arith.constant 0 : i32
    return %c0_i32, %c0_i32_0 : i32, i32
  }
  func.func @transform_5(%arg0: i32, %arg1: i32) -> (i32, i32) {
    %c0_i32 = arith.constant 0 : i32
    %c0_i32_0 = arith.constant 0 : i32
    %c0_i32_1 = arith.constant 0 : i32
    return %c0_i32, %c0_i32_0 : i32, i32
  }
  func.func @transform_6(%arg0: i32, %arg1: i32) -> (i32, i32) {
    %c0_i32 = arith.constant 0 : i32
    %c0_i32_0 = arith.constant 0 : i32
    %c0_i32_1 = arith.constant 0 : i32
    return %c0_i32, %c0_i32_0 : i32, i32
  }
  func.func @transform_7(%arg0: i32, %arg1: i32) -> (i32, i32) {
    %c0_i32 = arith.constant 0 : i32
    %c0_i32_0 = arith.constant 0 : i32
    %c0_i32_1 = arith.constant 0 : i32
    return %c0_i32, %c0_i32_0 : i32, i32
  }
  func.func @transform_8(%arg0: i32, %arg1: i32) -> (i32, i32) {
    %c0_i32 = arith.constant 0 : i32
    %c0_i32_0 = arith.constant 0 : i32
    %c0_i32_1 = arith.constant 0 : i32
    return %c0_i32, %c0_i32_0 : i32, i32
  }
  func.func @transform_9(%arg0: i32, %arg1: i32) -> (i32, i32) {
    %c0_i32 = arith.constant 0 : i32
    %c0_i32_0 = arith.constant 0 : i32
    %c0_i32_1 = arith.constant 0 : i32
    return %c0_i32, %c0_i32_0 : i32, i32
  }
  func.func @transform_10(%arg0: i32, %arg1: i32) -> (i32, i32) {
    %c0_i32 = arith.constant 0 : i32
    %c0_i32_0 = arith.constant 0 : i32
    %c0_i32_1 = arith.constant 0 : i32
    return %c0_i32, %c0_i32_0 : i32, i32
  }
  func.func @transform_11(%arg0: i32, %arg1: i32) -> (i32, i32) {
    %c0_i32 = arith.constant 0 : i32
    %c0_i32_0 = arith.constant 0 : i32
    %c0_i32_1 = arith.constant 0 : i32
    return %c0_i32, %c0_i32_0 : i32, i32
  }
  func.func @transform_12(%arg0: i32, %arg1: i32) -> (i32, i32, i32) {
    %c0_i32 = arith.constant 0 : i32
    %c0_i32_0 = arith.constant 0 : i32
    return %arg0, %arg1, %c0_i32 : i32, i32, i32
  }
}

</mosaic_0001>

<bundles_post_ra>
// kernel: trans_block_forward.4
= control target key start
LH: loop header
LB: loop body
LE: loop exit
PB: predicated region body
PF: predicated region fallthrough
CT: control target
= control target key end

     0   :  { %s992_s24 = smov 0   ;;  %s994_s25 = smov 0   ;;  %s1082_s0 = inlined_call_operand.vmem [shape: f32[2,8,32], index: 0, kind: input, shape index: {}]   ;;  %s1083_s1 = inlined_call_operand.vmem [shape: f32[1,32], index: 1, kind: input, shape index: {}]   ;;  %s1084_s2 = inlined_call_operand.vmem [shape: f32[1,32], index: 2, kind: input, shape index: {}]   ;;  %s1085_s3 = inlined_call_operand.vmem [shape: f32[32,96], index: 3, kind: input, shape index: {}]   ;;  %s1086_s4 = inlined_call_operand.vmem [shape: f32[1,96], index: 4, kind: input, shape index: {}]   ;;  %s1087_s5 = inlined_call_operand.vmem [shape: f32[2,4,8,8], index: 5, kind: output, shape index: {0}]   ;;  %s1088_s6 = inlined_call_operand.vmem [shape: f32[2,4,8,8], index: 6, kind: output, shape index: {1}]   ;;  %s1089_s7 = inlined_call_operand.vmem [shape: f32[2,4,8,8], index: 7, kind: output, shape index: {2}]  }
   0x1   :  { %s996_s26 = smov 0  }
   0x2 LB: > { %s30_s27 = sadd.s32 1, %s932_s25  ;;  %p826_p0 = scmp.ge.s32.totalorder %s936_s26, 1  ;;  %s936_s26 = sphi %s996_s26, %s18_s26   ;;  %s932_s25 = sphi %s994_s25, %s1091_s25   ;;  %s928_s24 = sphi %s992_s24, %s1090_s24  }
   0x3   : > { %p32_p1 = scmp.ge.s32.totalorder %s30_s27, 2  ;;  %p264_p2 = scmp.lt.s32.totalorder %s936_s26, 3 }
   0x5   : > { %s1093_s27 = smov (%p32_p1, %s30_s27), 0  ;;  %p265_p3 = pnand %p826_p0, %p264_p2 }
   0x6   : > { %p317_p4 = scmp.lt.s32.totalorder (!%p265_p3), %s928_s24, 1  ;;  %vm351_vm0 = vcmask (!%p265_p3), 261120   ;;  %v380_v7 = vld [vmem:[%s1085_s3] sm:$0xff] (!%p265_p3)  ;;  %v381_v8 = vld [vmem:[%s1085_s3 + $0x8] sm:$0xff] (!%p265_p3)  ;;  %v382_v9 = vld [vmem:[%s1085_s3 + $0x10] sm:$0xff] (!%p265_p3)  ;;  %v938_v10 = vmov (!%p265_p3), 0.0|0.0  }
   0x7   : > { %268 = sbr.rel (%p265_p3) target bundleno = 802 (0x322), region = 40  ;;  %868 = vmatprep.subr.bf16.mxu0 (!%p265_p3), %v938_v10  ;;  %v869_v11 = vpack.c.bf16 (!%p265_p3), %v381_v8, %v380_v7  ;;  %v383_v12 = vld [vmem:[%s1085_s3 + $0x18] sm:$0xff] (!%p265_p3)  ;;  %vm939_vm1 = vmmov (!%p265_p3), 0   ;;  %v940_v13 = vmov (!%p265_p3), 0.0   ;;  %v834_v19 = vld [vmem:[%s1083_s1] ss:$0 sm:$0xff] (!%p265_p3) }
   0x8   : > { %865 = vmatprep.mubr.msk.f32.mxu0 (!%p265_p3), %vm939_vm1, %v940_v13  ;;  %v872_v14 = vpack.c.bf16 (!%p265_p3), %v383_v12, %v382_v9  ;;  %v835_v21 = vld [vmem:[%s1084_s2] ss:$0 sm:$0xff] (!%p265_p3)  ;;  %vm464_vm2 = vcmask (!%p265_p3), 64512   ;;  %s942_s9 = smov (!%p265_p3), 96   ;;  %s944_s10 = smov (!%p265_p3), 56  }
   0x9   : > { %870 = vmatpush3.bf16.msra.mxu0 (!%p265_p3), %v869_v11  ;;  %v836_v24 = vld [vmem:[%s1086_s4] ss:$0 sm:$0xff] (!%p265_p3)  ;;  %s945_s11 = smov (!%p265_p3), 88   ;;  %s946_s12 = smov (!%p265_p3), 72  }
   0xa   : > { %871 = vmatprep.subr.bf16.mxu0 (!%p265_p3), %v938_v10  ;;  %s947_s13 = smov (!%p265_p3), 80   ;;  %s948_s14 = smov (!%p265_p3), 112  }
   0xb   : > { %s949_s15 = smov (!%p265_p3), 48   ;;  %s950_s16 = smov (!%p265_p3), 104  }
   0xc   : > { %s951_s17 = smov (!%p265_p3), 40  }
   0xd   : > { %873 = vmatpush3.bf16.msra.mxu0 (!%p265_p3), %v872_v14 }
   0xe   : > { %s1095_s24 = smov (!%p317_p4, %s928_s24), 1 }
   0xf   : > { %s827_s28 = sshll.u32 %s1095_s24, 3  ;;  %s1038_s21 = sshll.u32 %s1095_s24, 5 }
  0x10   : > { %s323_s8 = scalar_lea.vmem %s1082_s0, %s827_s28  ;;  %s1047_s30 = scalar_lea.vmem %s1087_s5, %s1038_s21 }
  0x11   : > { %v348_v0 = vld [vmem:[%s323_s8] sm:$0xff]  ;;  %s941_s8 = smov 64   ;;  %s943_s24 = smov 120  }
  0x12   : > { %v352_v1 = vsel %vm351_vm0, %v348_v0, 0.0  ;;  %s347_s20 = scalar_lea.vmem %s1089_s7, %s1038_s21  ;;  %s339_s28 = scalar_lea.vmem %s1088_s6, %s1038_s21 }
  0x13   : > { %353 = vadd.xlane.f32.xlu0 %v352_v1 }
  0xa0   : > { %v354_v2 = vpop.xlane.xlu0 %353 }
  0xa1   : > { %v356_v3 = vmul.f32 0.03125, %v354_v2 }
  0xa3   : > { %v357_v4 = vsub.f32 %v348_v0, %v356_v3 }
  0xa5   : > { %v358_v5 = vmul.f32 %v357_v4, %v357_v4 }
  0xa7   : > { %v359_v6 = vsel %vm351_vm0, %v358_v5, 0.0 }
  0xa8   : > { %360 = vadd.xlane.f32.xlu0 %v359_v6 }
 0x135   : > { %v361_v15 = vpop.xlane.xlu0 %360 }
 0x136   : > { %v362_v16 = vmul.f32 0.03125, %v361_v15 }
 0x138   : > { %v363_v17 = vadd.f32 1e-05, %v362_v16 }
 0x13a   : > { %912 = vrsqrt.f32 %v363_v17 }
 0x144   : > { %v913_v18 = vpop.eup %912 }
 0x145   : > { %v365_v20 = vmul.f32 %v913_v18, %v357_v4 }
 0x147   : > { %v372_v22 = vmul.f32 %v834_v19, %v365_v20 }
 0x149   : > { %v379_v23 = vadd.f32 %v835_v21, %v372_v22 }
 0x14b   : > { %866 = vmatmul.mubr.msk.f32.vlgmr.msra.gmra.mrb[0].mxu0 %vm351_vm0, %v379_v23 }
 0x21e   : > { %v460_v25 = vpop.f32.mrb[0].mxu0 }
 0x21f   : > { %v461_v26 = vadd.f32 %v836_v24, %v460_v25  ;;  %v867_v27 = vpop.f32.mrb[1].mxu0 }
 0x221   : > { %503 = vrot.lane.b32.xlu0 %v461_v26, %s941_s8  ;;  %467 = vrot.lane.b32.xlu1 %v461_v26, %s942_s9  ;;  %465 = vst.msk [vmem:[%s1047_s30] sm:$0xff] %vm464_vm2, %v461_v26 }
 0x225   : > { %507 = vrot.lane.b32.xlu0 %v461_v26, %s943_s24  ;;  %549 = vrot.lane.b32.xlu1 %v461_v26, %s944_s10 }
 0x229   : > { %512 = vrot.lane.b32.xlu0 %v461_v26, %s945_s11  ;;  %606 = vrot.lane.b32.xlu1 %v461_v26, %s946_s12 }
 0x22d   : > { %559 = vrot.lane.b32.xlu0 %v461_v26, %s947_s13  ;;  %554 = vrot.lane.b32.xlu1 %v461_v26, %s948_s14 }
 0x231   : > { %596 = vrot.lane.b32.xlu0 %v461_v26, %s949_s15 }
 0x235   : > { %601 = vrot.lane.b32.xlu0 %v461_v26, %s950_s16 }
 0x239   : > { %643 = vrot.lane.b32.xlu0 %v461_v26, %s951_s17 }
 0x293   : > { %v504_v28 = vpop.permute.xlu0 %503  ;;  %v468_v29 = vpop.permute.xlu1 %467 }
 0x294   : > { %506 = vst.msk [vmem:[%s347_s20] sm:$0xff] %vm464_vm2, %v504_v28  ;;  %470 = vxpose.xlu1.b32.start.end [1/1] (short) (narrow) %v468_v29, 8 }
 0x297   : > { %v508_v30 = vpop.permute.xlu0 %507  ;;  %v550_v31 = vpop.permute.xlu1 %549 }
 0x298   : > { %838 = vst.msk [vmem:[%s1047_s30 + $0x8] sm:$0xff] %vm464_vm2, %v508_v30  ;;  %840 = vst.msk [vmem:[%s347_s20 + $0x8] sm:$0xff] %vm464_vm2, %v550_v31 }
 0x29b   : > { %v513_v32 = vpop.permute.xlu0 %512  ;;  %v607_v33 = vpop.permute.xlu1 %606 }
 0x29c   : > { %515 = vxpose.xlu0.b32.start.end [1/1] (short) (narrow) %v513_v32, 8 }
 0x29f   : > { %v560_v34 = vpop.permute.xlu0 %559  ;;  %v555_v35 = vpop.permute.xlu1 %554 }
 0x2a0   : > { %841 = vst.msk [vmem:[%s1047_s30 + $0x10] sm:$0xff] %vm464_vm2, %v555_v35  ;;  %562 = vxpose.xlu1.b32.start.end [1/1] (short) (narrow) %v560_v34, 8  ;;  %609 = vxpose.xlu0.b32.start.end [1/1] (short) (narrow) %v607_v33, 8 }
 0x2a3   : > { %v597_v36 = vpop.permute.xlu0 %596 }
 0x2a4   : > { %843 = vst.msk [vmem:[%s347_s20 + $0x10] sm:$0xff] %vm464_vm2, %v597_v36 }
 0x2a7   : > { %v602_v37 = vpop.permute.xlu0 %601 }
 0x2a8   : > { %844 = vst.msk [vmem:[%s1047_s30 + $0x18] sm:$0xff] %vm464_vm2, %v602_v37 }
 0x2ab   : > { %v644_v38 = vpop.permute.xlu0 %643 }
 0x2ac   : > { %846 = vst.msk [vmem:[%s347_s20 + $0x18] sm:$0xff] %vm464_vm2, %v644_v38 }
 0x314   : > { %v486_v39 = vpop.trf.xlu1 }
 0x315   : > { %502 = vst.msk [vmem:[%s339_s28] sm:$0xff] %vm464_vm2, %v486_v39 }
 0x31c   : > { %v531_v40 = vpop.trf.xlu0 }
 0x31d   : > { %839 = vst.msk [vmem:[%s339_s28 + $0x8] sm:$0xff] %vm464_vm2, %v531_v40 }
 0x320   : > { %v625_v41 = vpop.trf.xlu0  ;;  %v578_v42 = vpop.trf.xlu1 }
 0x321   : > { %845 = vst.msk [vmem:[%s339_s28 + $0x18] sm:$0xff] %vm464_vm2, %v625_v41  ;;  %842 = vst.msk [vmem:[%s339_s28 + $0x10] sm:$0xff] %vm464_vm2, %v578_v42 }
 0x322 PF: > { %s18_s26 = sadd.s32 1, %s936_s26   ;;  %s1090_s24 = smov %s932_s25 }
 0x323   : > { %p15_p5 = scmp.ge.s32.totalorder %s18_s26, 4   ;;  %s1091_s25 = smov %s1093_s27 }
 0x325   :  { %17 = sbr.rel (!%p15_p5) target bundleno = 2 (0x2), region = 103 }

// kernel: trans_block_forward.7
= control target key start
LH: loop header
LB: loop body
LE: loop exit
PB: predicated region body
PF: predicated region fallthrough
CT: control target
= control target key end

     0   :  { %s2498_s0 = inlined_call_operand.vmem [shape: f32[2,8,32], index: 0, kind: input, shape index: {}]   ;;  %s2499_s1 = inlined_call_operand.vmem [shape: f32[2,4,8,8], index: 1, kind: input, shape index: {}]   ;;  %s2500_s2 = inlined_call_operand.vmem [shape: f32[2,4,8,8], index: 2, kind: input, shape index: {}]   ;;  %s2501_s3 = inlined_call_operand.vmem [shape: f32[2,4,8,8], index: 3, kind: input, shape index: {}]   ;;  %s2502_s4 = inlined_call_operand.vmem [shape: f32[32,32], index: 4, kind: input, shape index: {}]   ;;  %s2503_s5 = inlined_call_operand.vmem [shape: f32[1,32], index: 5, kind: input, shape index: {}]   ;;  %s2504_s6 = inlined_call_operand.vmem [shape: f32[1,32], index: 6, kind: input, shape index: {}]   ;;  %s2505_s7 = inlined_call_operand.vmem [shape: f32[1,32], index: 7, kind: input, shape index: {}]   ;;  %s2506_s8 = inlined_call_operand.vmem [shape: f32[32,64], index: 8, kind: input, shape index: {}]   ;;  %s2507_s9 = inlined_call_operand.vmem [shape: f32[1,64], index: 9, kind: input, shape index: {}]   ;;  %s2508_s10 = inlined_call_operand.vmem [shape: f32[64,32], index: 10, kind: input, shape index: {}]   ;;  %s2509_s11 = inlined_call_operand.vmem [shape: f32[1,32], index: 11, kind: input, shape index: {}]   ;;  %s2510_s12 = inlined_call_operand.hbm [shape: f32[2,8,32], index: 12, kind: output, shape index: {}]  }
   0x1   :  { %2511 = sst [smem:[#allocation5_spill]] %s2498_s0 }
   0x2   :  { %2512 = sst [smem:[#allocation6_spill]] %s2499_s1 }
   0x3   :  { %2513 = sst [smem:[#allocation7_spill]] %s2500_s2 }
   0x4   :  { %17 = vsyncpa [#allocation3], 0 }
   0x5   :  { %19 = vsyncpa [#allocation3 + $0x1], 0  ;;  %s2223_s21 = smov 0   ;;  %s2225_s22 = smov 0  }
   0x6   :  { %s2227_s23 = smov 0   ;;  %s2229_s24 = smov 0  }
   0x7   :  { %s2231_s25 = smov 0   ;;  %s2233_s26 = smov 0  }
   0x8 LB: > { %s1804_s27 = sadd.s32 4294967295, %s2152_s26   ;;  %s1805_s28 = sadd.s32 4294967294, %s2152_s26   ;;  %s2152_s26 = sphi %s2233_s26, %s25_s26   ;;  %s2148_s25 = sphi %s2231_s25, %s2523_s25   ;;  %s2144_s24 = sphi %s2229_s24, %s2522_s24   ;;  %s2140_s23 = sphi %s2227_s23, %s2521_s23   ;;  %s2136_s22 = sphi %s2225_s22, %s2520_s22   ;;  %s2132_s21 = sphi %s2223_s21, %s2519_s21  }
   0x9   : > { %s37_s29 = sadd.s32 1, %s2148_s25  ;;  %s322_s30 = sadd.s32 1, %s2140_s23 }
   0xa   : > { %p39_p0 = scmp.ge.s32.totalorder %s37_s29, 2  ;;  %p332_p1 = scmp.ne.s32.totalorder %s2140_s23, %s2136_s22 }
   0xb   : > { %p333_p2 = scmp.eq.s32.totalorder %s1804_s27, 1  ;;  %p338_p3 = scmp.ne.s32.totalorder %s2136_s22, %s2132_s21 }
   0xc   : > { %s2525_s29 = smov (%p39_p0, %s37_s29), 0  ;;  %p339_p5 = scmp.eq.s32.totalorder %s1805_s28, 1 }
   0xd   : > { %p2263_p4 = por %p333_p2, %p332_p1  ;;  %s317_s14 = ssub.s32 %s2148_s25, %s2525_s29 }
   0xe   : > { %p1808_p6 = scmp.ge.s32.totalorder %s2152_s26, 1  ;;  %p320_p7 = scmp.eq.s32.totalorder %s317_s14, 0 }
   0xf   : > { %p2270_p8 = por %p339_p5, %p338_p3  ;;  %p418_p9 = scmp.lt.s32.totalorder %s2152_s26, 3 }
  0x10   : > { %s2276_s16 = scalar_select %p320_p7, %s2140_s23, %s322_s30  }
  0x11   : > { %p419_p10 = pnand %p1808_p6, %p418_p9 }
  0x12   : > { %p480_p11 = scmp.lt.s32.totalorder (!%p419_p10), %s2144_s24, 1  ;;  %v2154_v0 = vmov (!%p419_p10), 0.0   ;;  %vm2155_vm0 = vmmov (!%p419_p10), 0   ;;  %s2516_s2 = sld [smem:[#allocation7_spill]] (!%p419_p10)  ;;  %vm507_vm1 = vcmask (!%p419_p10), 64512   ;;  %v830_v28 = vld [vmem:[%s2502_s4 + $0x8] sm:$0xff] (!%p419_p10) }
  0x13   : > { %422 = sbr.rel (%p419_p10) target bundleno = 3549 (0xddd), region = 68  ;;  %1890 = vmatprep.subr.mxu0 (!%p419_p10), %v2154_v0  ;;  %1892 = vmatprep.mubr.msk.f32.mxu0 (!%p419_p10), %vm2155_vm0, %v2154_v0  ;;  %s2517_s1 = sld [smem:[#allocation6_spill]] (!%p419_p10)  ;;  %v666_v32 = vld [vmem:[%s2502_s4] sm:$0xff] (!%p419_p10)  ;;  %v1140_v56 = vld [vmem:[%s2502_s4 + $0x10] sm:$0xff] (!%p419_p10)  ;;  %vm1465_vm2 = vcmask (!%p419_p10), 261120   ;;  %vm1594_vm3 = vcmask (!%p419_p10), 523264  }
  0x14   : > { %1905 = vmatprep.subr.mxu1 (!%p419_p10), %v2154_v0  ;;  %1907 = vmatprep.mubr.msk.f32.mxu1 (!%p419_p10), %vm2155_vm0, %v2154_v0  ;;  %s2518_s0 = sld [smem:[#allocation5_spill]] (!%p419_p10)  ;;  %s1846_s20 = sshll.u32 (!%p419_p10), %s2144_s24, 7 }
  0x1a   : > { %s2283_s17 = scalar_select %p480_p11, %s2144_s24, 1 }
  0x1c   : > { %s1849_s18 = sshll.u32 %s2283_s17, 5 }
  0x1d   : > { %s2292_s27 = scalar_lea.vmem %s2516_s2, %s1849_s18  ;;  %s2297_s14 = scalar_lea.vmem %s2517_s1, %s1849_s18 }
  0x1e   : > { %v506_v1 = vld [vmem:[%s2292_s27] sm:$0xff]  ;;  %s2310_s28 = scalar_lea.vmem %s2501_s3, %s1849_s18  ;;  %v1820_v15 = vld [vmem:[%s2292_s27 + $0x8] sm:$0xff]  ;;  %v1827_v33 = vld [vmem:[%s2292_s27 + $0x10] sm:$0xff] }
  0x1f   : > { %v505_v2 = vld [vmem:[%s2297_s14] sm:$0xff]  ;;  %1891 = vmatpush3.msra.mxu0 %v506_v1  ;;  %v1819_v16 = vld [vmem:[%s2297_s14 + $0x8] sm:$0xff]  ;;  %v1826_v36 = vld [vmem:[%s2297_s14 + $0x10] sm:$0xff] }
  0x20   : > { %1893 = vmatmul.mubr.msk.f32.vlgmr.msra.gmra.mrb[0].mxu0 %vm507_vm1, %v505_v2  ;;  %1895 = vmatprep.subr.mxu0 %v2154_v0  ;;  %v592_v11 = vld [vmem:[%s2310_s28] sm:$0xff]  ;;  %v1822_v27 = vld [vmem:[%s2310_s28 + $0x8] sm:$0xff]  ;;  %v1829_v50 = vld [vmem:[%s2310_s28 + $0x10] sm:$0xff] }
  0x21   : > { %1897 = vmatprep.mubr.msk.f32.mxu0 %vm2155_vm0, %v2154_v0  ;;  %1896 = vmatpush3.msra.mxu0 %v592_v11  ;;  %v1833_v54 = vld [vmem:[%s2292_s27 + $0x18] sm:$0xff] }
  0x22   : > { %1900 = vmatprep.subr.mxu0 %v2154_v0  ;;  %1906 = vmatpush3.msra.mxu1 %v1822_v27  ;;  %v1832_v55 = vld [vmem:[%s2297_s14 + $0x18] sm:$0xff]  ;;  %v1495_v27 = vld [vmem:[%s2506_s8 + $0x8] sm:$0xff]  ;;  %s2450_s14 = scalar_lea.hbm %s2510_s12, %s1846_s20 }
  0x23   : > { %1915 = vmatprep.subr.mxu1 %v2154_v0 }
  0xf3   : > { %v577_v3 = vpop.f32.mrb[0].mxu0 }
  0xf4   : > { %v1894_v4 = vpop.f32.mrb[1].mxu0  ;;  %v581_v5 = vsel %vm507_vm1, %v577_v3, -inf }
  0xf5   : > { %582 = vmax.xlane.f32.xlu0 %v581_v5  ;;  %v1835_v4 = vld [vmem:[%s2310_s28 + $0x18] sm:$0xff]  ;;  %s1810_s28 = sshll.u32 %s2283_s17, 3 }
  0xf6   : > { %v1378_v5 = vld [vmem:[%s2502_s4 + $0x18] sm:$0xff]  ;;  %s486_s18 = scalar_lea.vmem %s2518_s0, %s1810_s28  ;;  %s477_s0 = sand.u32 1, %s2136_s22  }
  0xf7   : > { %s1809_s1 = sshll.u32 %s477_s0, 3  ;;  %s1671_s28 = scalar_lea.sflag [#allocation3], %s477_s0 }
 0x182   : > { %v583_v6 = vpop.xlane.xlu0 %582 }
 0x183   : > { %v584_v7 = vsub.f32 %v577_v3, %v583_v6 }
 0x185   : > { %v585_v8 = vmul.f32 1.442695, %v584_v7 }
 0x187   : > { %2056 = vpow2.f32 %v585_v8 }
 0x191   : > { %v2057_v9 = vpop.eup %2056 }
 0x192   : > { %v587_v10 = vsel %vm507_vm1, %v2057_v9, 0.0 }
 0x193   : > { %588 = vadd.xlane.f32.xlu0 %v587_v10 }
 0x220   : > { %v589_v12 = vpop.xlane.xlu0 %588 }
 0x221   : > { %2058 = vrcp.f32 %v589_v12 }
 0x22b   : > { %v2059_v13 = vpop.eup %2058 }
 0x22c   : > { %v591_v14 = vmul.f32 %v2059_v13, %v2057_v9 }
 0x22e   : > { %1898 = vmatmul.mubr.msk.f32.vlgmr.msra.gmra.mrb[2].mxu0 %vm507_vm1, %v591_v14 }
 0x22f   : > { %1901 = vmatpush3.msra.mxu0 %v1820_v15  ;;  %1902 = vmatprep.mubr.msk.f32.mxu0 %vm2155_vm0, %v2154_v0  ;;  %v1453_v15 = vld [vmem:[%s486_s18] sm:$0xff]  ;;  %s479_s18 = scalar_lea.vmem [#allocation2], %s1809_s1  ;;  %s2157_s1 = smov [#allocation2]  }
 0x230   : > { %1910 = vmatprep.subr.mxu0 %v2154_v0  ;;  %s1685_s30 = sshll.u32 %s479_s18, 4  ;;  %s2078_s19 = sshll.u32 %s2157_s1, 4  ;;  %s2452_s30 = int_to_ptr.vmem [resolvable:$true] %s1685_s30  ;;  %s2079_s19 = int_to_ptr.vmem [resolvable:$false] %s2078_s19 }
 0x231   : > { %s2074_s24 = scalar_lea.vmem %s2452_s30, 128  ;;  %s2080_s2 = scalar_lea.vmem %s2079_s19, 256 }
 0x232   : > { %1903 = vmatmul.mubr.msk.f32.vlgmr.msra.gmra.mrb[4].mxu0 %vm507_vm1, %v1819_v16  ;;  %p2075_p12 = scmp.ne.s32.totalorder %s2452_s30, %s2074_s24  ;;  %p2081_p1 = scmp.lt.s32.totalorder %s2452_s30, %s2079_s19 }
 0x233   : > { %1912 = vmatprep.mubr.msk.f32.mxu0 %vm2155_vm0, %v2154_v0  ;;  %1911 = vmatpush3.msra.mxu0 %v830_v28  ;;  %p2082_p2 = scmp.lt.s32.totalorder %s2080_s2, %s2074_s24 }
 0x234   : > { %1920 = vmatprep.subr.mxu0 %v2154_v0  ;;  %p2076_p13 = pnand %p2075_p12, %p2263_p4 }
 0x235   : > { %p2083_p3 = por %p2082_p2, %p2081_p1 }
 0x236   : > { %p2077_p0 = pneg %p2076_p13 }
 0x238   : > { %p2084_p5 = pnand %p2083_p3, %p2077_p0 }
 0x301   : > { %v662_v17 = vpop.f32.mrb[2].mxu0 }
 0x302   : > { %v1899_v18 = vpop.f32.mrb[3].mxu0 }
 0x303   : > { %v1838_v18 = vld [vmem:[%s2503_s5] ss:$0 sm:$0xff] }
 0x305   : > { %v740_v19 = vpop.f32.mrb[4].mxu0 }
 0x306   : > { %v1904_v20 = vpop.f32.mrb[5].mxu0  ;;  %v744_v21 = vsel %vm507_vm1, %v740_v19, -inf }
 0x307   : > { %745 = vmax.xlane.f32.xlu1 %v744_v21 }
 0x394   : > { %v746_v22 = vpop.xlane.xlu1 %745 }
 0x395   : > { %v747_v23 = vsub.f32 %v740_v19, %v746_v22 }
 0x397   : > { %v748_v24 = vmul.f32 1.442695, %v747_v23 }
 0x399   : > { %2060 = vpow2.f32 %v748_v24 }
 0x3a3   : > { %v2061_v25 = vpop.eup %2060 }
 0x3a4   : > { %v750_v26 = vsel %vm507_vm1, %v2061_v25, 0.0 }
 0x3a5   : > { %751 = vadd.xlane.f32.xlu1 %v750_v26  ;;  %v1494_v26 = vld [vmem:[%s2506_s8] sm:$0xff] }
 0x3a6   : > { %v1981_v28 = vpack.c.bf16 %v1495_v27, %v1494_v26 }
 0x432   : > { %v752_v29 = vpop.xlane.xlu1 %751 }
 0x433   : > { %2062 = vrcp.f32 %v752_v29  ;;  %v2156_v29 = vmov 0.0|0.0  }
 0x43d   : > { %v2063_v30 = vpop.eup %2062 }
 0x43e   : > { %v754_v31 = vmul.f32 %v2063_v30, %v2061_v25  ;;  %v1496_v30 = vld [vmem:[%s2506_s8 + $0x10] sm:$0xff] }
 0x440   : > { %1908 = vmatmul.mubr.msk.f32.vlgmr.msra.gmra.mrb[0].mxu1 %vm507_vm1, %v754_v31  ;;  %v1497_v31 = vld [vmem:[%s2506_s8 + $0x18] sm:$0xff] }
 0x441   : > { %1916 = vmatpush3.msra.mxu1 %v666_v32  ;;  %1917 = vmatprep.mubr.msk.f32.mxu1 %vm2155_vm0, %v2154_v0  ;;  %v1984_v32 = vpack.c.bf16 %v1497_v31, %v1496_v30 }
 0x442   : > { %1925 = vmatprep.subr.mxu1 %v2154_v0 }
 0x444   : > { %1918 = vmatmul.mubr.msk.f32.vlgmr.msra.gmra.mrb[2].mxu1 %vm507_vm1, %v662_v17 }
 0x445   : > { %1927 = vmatprep.mubr.msk.f32.mxu1 %vm2155_vm0, %v2154_v0  ;;  %1926 = vmatpush3.msra.mxu1 %v1829_v50 }
 0x446   : > { %1935 = vmatprep.subr.mxu1 %v2154_v0 }
 0x513   : > { %v826_v34 = vpop.f32.mrb[0].mxu1 }
 0x514   : > { %v1909_v35 = vpop.f32.mrb[1].mxu1  ;;  %1913 = vmatmul.mubr.msk.f32.vlgmr.msra.gmra.mrb[6].mxu0 %vm507_vm1, %v826_v34  ;;  %v1580_v34 = vld [vmem:[%s2508_s10 + $0x8] sm:$0xff] }
 0x515   : > { %1921 = vmatpush3.msra.mxu0 %v1827_v33  ;;  %1922 = vmatprep.mubr.msk.f32.mxu0 %vm2155_vm0, %v2154_v0  ;;  %v1579_v33 = vld [vmem:[%s2508_s10] sm:$0xff]  ;;  %v1581_v35 = vld [vmem:[%s2508_s10 + $0x10] sm:$0xff] }
 0x516   : > { %1930 = vmatprep.subr.mxu0 %v2154_v0 }
 0x517   : > { %v973_v37 = vpop.f32.mrb[2].mxu1 }
 0x518   : > { %v1919_v38 = vpop.f32.mrb[3].mxu1  ;;  %1923 = vmatmul.mubr.msk.f32.vlgmr.msra.gmra.mrb[8].mxu0 %vm507_vm1, %v1826_v36  ;;  %v1987_v36 = vpack.c.bf16 %v1580_v34, %v1579_v33 }
 0x519   : > { %1932 = vmatprep.mubr.msk.f32.mxu0 %vm2155_vm0, %v2154_v0  ;;  %1931 = vmatpush3.msra.mxu0 %v1140_v56 }
 0x51a   : > { %1940 = vmatprep.subr.mxu0 %v2154_v0 }
 0x5e7   : > { %v900_v39 = vpop.f32.mrb[6].mxu0 }
 0x5e8   : > { %v974_v40 = vadd.f32 %v973_v37, %v900_v39  ;;  %v1914_v41 = vpop.f32.mrb[7].mxu0  ;;  %v1582_v37 = vld [vmem:[%s2508_s10 + $0x18] sm:$0xff]  ;;  %v1583_v39 = vld [vmem:[%s2508_s10 + $0x20] sm:$0xff] }
 0x5e9   : > { %v1990_v38 = vpack.c.bf16 %v1582_v37, %v1581_v35 }
 0x5eb   : > { %v1050_v42 = vpop.f32.mrb[8].mxu0 }
 0x5ec   : > { %v1924_v43 = vpop.f32.mrb[9].mxu0  ;;  %v1054_v44 = vsel %vm507_vm1, %v1050_v42, -inf }
 0x5ed   : > { %1055 = vmax.xlane.f32.xlu0 %v1054_v44 }
 0x67a   : > { %v1056_v45 = vpop.xlane.xlu0 %1055 }
 0x67b   : > { %v1057_v46 = vsub.f32 %v1050_v42, %v1056_v45 }
 0x67d   : > { %v1058_v47 = vmul.f32 1.442695, %v1057_v46  ;;  %v1839_v46 = vld [vmem:[%s2504_s6] ss:$0 sm:$0xff] }
 0x67f   : > { %2064 = vpow2.f32 %v1058_v47 }
 0x689   : > { %v2065_v48 = vpop.eup %2064 }
 0x68a   : > { %v1060_v49 = vsel %vm507_vm1, %v2065_v48, 0.0 }
 0x68b   : > { %1061 = vadd.xlane.f32.xlu1 %v1060_v49 }
 0x718   : > { %v1062_v51 = vpop.xlane.xlu1 %1061 }
 0x719   : > { %2066 = vrcp.f32 %v1062_v51  ;;  %v1585_v51 = vld [vmem:[%s2508_s10 + $0x30] sm:$0xff] }
 0x723   : > { %v2067_v52 = vpop.eup %2066 }
 0x724   : > { %v1064_v53 = vmul.f32 %v2067_v52, %v2065_v48  ;;  %v1840_v48 = vld [vmem:[%s2505_s7] ss:$0 sm:$0xff]  ;;  %v1586_v52 = vld [vmem:[%s2508_s10 + $0x38] sm:$0xff] }
 0x726   : > { %1928 = vmatmul.mubr.msk.f32.vlgmr.msra.gmra.mrb[4].mxu1 %vm507_vm1, %v1064_v53  ;;  %v1996_v53 = vpack.c.bf16 %v1586_v52, %v1585_v51 }
 0x727   : > { %1936 = vmatpush3.msra.mxu1 %v1833_v54  ;;  %1937 = vmatprep.mubr.msk.f32.mxu1 %vm2155_vm0, %v2154_v0  ;;  %v1841_v54 = vld [vmem:[%s2507_s9] ss:$0 sm:$0xff] }
 0x728   : > { %1945 = vmatprep.subr.mxu1 %v2154_v0 }
 0x72a   : > { %1938 = vmatmul.mubr.msk.f32.vlgmr.msra.gmra.mrb[6].mxu1 %vm507_vm1, %v1832_v55 }
 0x72b   : > { %1947 = vmatprep.mubr.msk.f32.mxu1 %vm2155_vm0, %v2154_v0  ;;  %1946 = vmatpush3.msra.mxu1 %v1378_v5 }
 0x72c   : > { %1986 = vmatprep.subr.bf16.mxu1 %v2156_v29 }
 0x7f9   : > { %v1136_v57 = vpop.f32.mrb[4].mxu1 }
 0x7fa   : > { %v1929_v58 = vpop.f32.mrb[5].mxu1  ;;  %1933 = vmatmul.mubr.msk.f32.vlgmr.msra.gmra.mrb[10].mxu0 %vm507_vm1, %v1136_v57 }
 0x7fb   : > { %1942 = vmatprep.mubr.msk.f32.mxu0 %vm2155_vm0, %v2154_v0  ;;  %1941 = vmatpush3.msra.mxu0 %v1835_v4 }
 0x7fc   : > { %1980 = vmatprep.subr.bf16.mxu0 %v2156_v29 }
 0x7fd   : > { %v1288_v59 = vpop.f32.mrb[6].mxu1 }
 0x7fe   : > { %v1939_v60 = vpop.f32.mrb[7].mxu1  ;;  %v1292_v61 = vsel %vm507_vm1, %v1288_v59, -inf }
 0x7ff   : > { %1293 = vmax.xlane.f32.xlu0 %v1292_v61 }
 0x88c   : > { %v1294_v62 = vpop.xlane.xlu0 %1293 }
 0x88d   : > { %v1295_v63 = vsub.f32 %v1288_v59, %v1294_v62  ;;  %v1843_v59 = vld [vmem:[%s2509_s11] ss:$0 sm:$0xff] }
 0x88f   : > { %v1296_v1 = vmul.f32 1.442695, %v1295_v63 }
 0x891   : > { %2068 = vpow2.f32 %v1296_v1 }
 0x89b   : > { %v2069_v2 = vpop.eup %2068 }
 0x89c   : > { %v1298_v3 = vsel %vm507_vm1, %v2069_v2, 0.0 }
 0x89d   : > { %1299 = vadd.xlane.f32.xlu1 %v1298_v3 }
 0x8cd   : > { %v1210_v6 = vpop.f32.mrb[10].mxu0 }
 0x8ce   : > { %v1214_v7 = vadd.f32 %v1210_v6, %v974_v40  ;;  %v1934_v8 = vpop.f32.mrb[11].mxu0  ;;  %v1584_v40 = vld [vmem:[%s2508_s10 + $0x28] sm:$0xff] }
 0x8cf   : > { %v1993_v41 = vpack.c.bf16 %v1584_v40, %v1583_v39 }
 0x92a   : > { %v1300_v9 = vpop.xlane.xlu1 %1299 }
 0x92b   : > { %2070 = vrcp.f32 %v1300_v9 }
 0x935   : > { %v2071_v10 = vpop.eup %2070 }
 0x936   : > { %v1302_v11 = vmul.f32 %v2071_v10, %v2069_v2 }
 0x938   : > { %1943 = vmatmul.mubr.msk.f32.vlgmr.msra.gmra.mrb[12].mxu0 %vm507_vm1, %v1302_v11 }
 0x939   : > { %1958 = vmatprep.mubr.msk.f32.mxu0 %vm2155_vm0, %v2154_v0  ;;  %1982 = vmatpush3.bf16.msra.mxu0 %v1981_v28 }
 0x93a   : > { %1983 = vmatprep.subr.bf16.mxu0 %v2156_v29 }
 0x93d   : > { %1985 = vmatpush3.bf16.msra.mxu0 %v1984_v32 }
 0xa0b   : > { %v1374_v12 = vpop.f32.mrb[12].mxu0 }
 0xa0c   : > { %v1944_v13 = vpop.f32.mrb[13].mxu0  ;;  %1948 = vmatmul.mubr.msk.f32.vlgmr.msra.gmra.mrb[8].mxu1 %vm507_vm1, %v1374_v12 }
 0xa0d   : > { %1977 = vmatprep.mubr.msk.f32.mxu1 %vm2155_vm0, %v2154_v0  ;;  %1988 = vmatpush3.bf16.msra.mxu1 %v1987_v36 }
 0xa0e   : > { %1989 = vmatprep.subr.bf16.mxu1 %v2156_v29 }
 0xa11   : > { %1991 = vmatpush3.bf16.msra.mxu1 %v1990_v38 }
 0xa12   : > { %1992 = vmatprep.subr.bf16.mxu1 %v2156_v29 }
 0xa15   : > { %1994 = vmatpush3.bf16.msra.mxu1 %v1993_v41 }
 0xa16   : > { %1995 = vmatprep.subr.bf16.mxu1 %v2156_v29 }
 0xa19   : > { %1997 = vmatpush3.bf16.msra.mxu1 %v1996_v53 }
 0xadf   : > { %v1448_v14 = vpop.f32.mrb[8].mxu1 }
 0xae0   : > { %v1452_v16 = vadd.f32 %v1448_v14, %v1214_v7  ;;  %v1949_v17 = vpop.f32.mrb[9].mxu1 }
 0xae2   : > { %v1454_v19 = vadd.f32 %v1453_v15, %v1452_v16 }
 0xae4   : > { %v2389_v20 = vadd.f32 %v1838_v18, %v1454_v19 }
 0xae6   : > { %v1466_v0 = vsel %vm1465_vm2, %v2389_v20, 0.0 }
 0xae7   : > { %1467 = vadd.xlane.f32.xlu0 %v1466_v0 }
 0xb74   : > { %v1468_v21 = vpop.xlane.xlu0 %1467 }
 0xb75   : > { %v1470_v22 = vmul.f32 0.03125, %v1468_v21 }
 0xb77   : > { %v1471_v23 = vsub.f32 %v2389_v20, %v1470_v22 }
 0xb79   : > { %v1472_v24 = vmul.f32 %v1471_v23, %v1471_v23 }
 0xb7b   : > { %v1473_v25 = vsel %vm1465_vm2, %v1472_v24, 0.0 }
 0xb7c   : > { %1474 = vadd.xlane.f32.xlu1 %v1473_v25 }
 0xc09   : > { %v1475_v42 = vpop.xlane.xlu1 %1474 }
 0xc0a   : > { %v1476_v43 = vmul.f32 0.03125, %v1475_v42 }
 0xc0c   : > { %v1477_v44 = vadd.f32 1e-05, %v1476_v43 }
 0xc0e   : > { %2072 = vrsqrt.f32 %v1477_v44 }
 0xc18   : > { %v2073_v45 = vpop.eup %2072 }
 0xc19   : > { %v1479_v47 = vmul.f32 %v2073_v45, %v1471_v23 }
 0xc1b   : > { %v1486_v49 = vmul.f32 %v1839_v46, %v1479_v47 }
 0xc1d   : > { %v1493_v50 = vadd.f32 %v1840_v48, %v1486_v49 }
 0xc1f   : > { %1959 = vmatmul.mubr.msk.f32.vlgmr.msra.gmra.mrb[14].mxu0 %vm1465_vm2, %v1493_v50 }
 0xcf2   : > { %v1574_v55 = vpop.f32.mrb[14].mxu0 }
 0xcf3   : > { %v1575_v56 = vadd.f32 %v1841_v54, %v1574_v55  ;;  %v1960_v57 = vpop.f32.mrb[15].mxu0 }
 0xcf5   : > { %v1578_v58 = vmax.f32 %v1575_v56, 0.0 }
 0xcf7   : > { %1978 = vmatmul.mubr.msk.f32.vlgmr.msra.gmra.mrb[10].mxu1 %vm1594_vm3, %v1578_v58 }
 0xdca   : > { %v1664_v60 = vpop.f32.mrb[10].mxu1 }
 0xdcb   : > { %v1665_v61 = vadd.f32 %v1843_v59, %v1664_v60  ;;  %v1979_v62 = vpop.f32.mrb[11].mxu1 }
 0xdcd   : > { %v1668_v63 = vadd.f32 %v1665_v61, %v2389_v20 }
 0xdcf   : > { %1669 = vst.msk [vmem:[%s479_s18] sm:$0xff] %vm1465_vm2, %v1668_v63 }
 0xdd0   : > { %2087 = shalt.err (!%p2084_p5)
}
 0xdd1   : > { %s2088_s0 = scalar_lea.hbm %s2450_s14, 128  ;;  %s2092_s27 = scalar_lea.hbm %s2510_s12, 256 }
 0xdd2   : > { %p2089_p6 = scmp.ne.s32.totalorder %s2450_s14, %s2088_s0  ;;  %p2093_p10 = scmp.lt.u32.totalorder %s2450_s14, %s2510_s12 }
 0xdd3   : > { %p2094_p11 = scmp.lt.u32.totalorder %s2092_s27, %s2088_s0  ;;  %p2096_p13 = scmp.lt.u32.totalorder %s2088_s0, %s2450_s14 }
 0xdd4   : > { %p2090_p7 = pnand %p2089_p6, %p2263_p4 }
 0xdd5   : > { %p2095_p12 = por %p2094_p11, %p2093_p10 }
 0xdd6   : > { %p2091_p9 = pneg %p2090_p7 }
 0xdd7   : > { %p2097_p0 = por %p2096_p13, %p2095_p12 }
 0xdd9   : > { %p2098_p1 = pnand %p2097_p0, %p2091_p9 }
 0xddb   : > { %2101 = shalt.err (!%p2098_p1)
}
 0xddc   : > { %1998 = dma.vmem_to_hbm [thread:$0]  (%p2263_p4), %s2452_s30, 128, %s2450_s14, %s1671_s28  }
 0xddd PF: > { %p2004_p2 = scmp.ge.s32.totalorder %s2152_s26, 2  ;;  %s1697_s2 = sand.u32 1, %s2132_s21  }
 0xdde   : > { %s1698_s24 = scalar_lea.sflag [#allocation3], %s1697_s2 }
 0xddf   : > { %p2001_p3 = pnand %p2004_p2, %p2270_p8 }
 0xde1   : > { %2127 = dma.done.wait (!%p2001_p3), %s1698_s24, 128  }
 0xde2   : > { %2129 = vsyncadd (!%p2001_p3), %s1698_s24, 4294967168  ;;  %s25_s26 = sadd.s32 1, %s2152_s26   ;;  %s2519_s21 = smov %s2136_s22 }
 0xde3   : > { %p22_p5 = scmp.ge.s32.totalorder %s25_s26, 4   ;;  %s2520_s22 = smov %s2140_s23 }
 0xde4   : > { %s2521_s23 = smov %s2276_s16  ;;  %s2522_s24 = smov %s2148_s25 }
 0xde5   : > { %s2523_s25 = smov %s2525_s29  ;;  %24 = sbr.rel (!%p22_p5) target bundleno = 8 (0x8), region = 121 }
 0xdec   :  { %1703 = vsyncpa [#allocation3], 1 }
 0xded   :  { %1705 = vsyncpa [#allocation3 + $0x1], 1 }

// kernel: trans_block_forward.5
= control target key start
LH: loop header
LB: loop body
LE: loop exit
PB: predicated region body
PF: predicated region fallthrough
CT: control target
= control target key end

     0   :  { %s2128_s21 = smov 0   ;;  %s2130_s22 = smov 0   ;;  %s2328_s0 = inlined_call_operand.vmem [shape: f32[2,8,32], index: 0, kind: input, shape index: {}]   ;;  %s2329_s1 = inlined_call_operand.vmem [shape: f32[2,4,8,8], index: 1, kind: input, shape index: {}]   ;;  %s2330_s2 = inlined_call_operand.vmem [shape: f32[2,4,8,8], index: 2, kind: input, shape index: {}]   ;;  %s2331_s3 = inlined_call_operand.vmem [shape: f32[2,4,8,8], index: 3, kind: input, shape index: {}]   ;;  %s2332_s4 = inlined_call_operand.vmem [shape: f32[32,32], index: 4, kind: input, shape index: {}]   ;;  %s2333_s5 = inlined_call_operand.vmem [shape: f32[1,32], index: 5, kind: input, shape index: {}]   ;;  %s2334_s6 = inlined_call_operand.vmem [shape: f32[1,32], index: 6, kind: input, shape index: {}]   ;;  %s2335_s7 = inlined_call_operand.vmem [shape: f32[1,32], index: 7, kind: input, shape index: {}]   ;;  %s2336_s8 = inlined_call_operand.vmem [shape: f32[32,64], index: 8, kind: input, shape index: {}]   ;;  %s2337_s9 = inlined_call_operand.vmem [shape: f32[1,64], index: 9, kind: input, shape index: {}]   ;;  %s2338_s10 = inlined_call_operand.vmem [shape: f32[64,32], index: 10, kind: input, shape index: {}]   ;;  %s2339_s11 = inlined_call_operand.vmem [shape: f32[1,32], index: 11, kind: input, shape index: {}]   ;;  %s2340_s12 = inlined_call_operand.vmem [shape: f32[2,8,32], index: 12, kind: output, shape index: {}]  }
   0x1   :  { %s2132_s23 = smov 0  }
   0x2 LB: > { %s34_s24 = sadd.s32 1, %s2054_s22  ;;  %p1803_p0 = scmp.ge.s32.totalorder %s2058_s23, 1  ;;  %s2058_s23 = sphi %s2132_s23, %s22_s23   ;;  %s2054_s22 = sphi %s2130_s22, %s2342_s22   ;;  %s2050_s21 = sphi %s2128_s21, %s2341_s21  }
   0x3   : > { %p36_p1 = scmp.ge.s32.totalorder %s34_s24, 2  ;;  %p415_p2 = scmp.lt.s32.totalorder %s2058_s23, 3 }
   0x5   : > { %s2344_s24 = smov (%p36_p1, %s34_s24), 0  ;;  %p416_p3 = pnand %p1803_p0, %p415_p2 }
   0x6   : > { %p479_p4 = scmp.lt.s32.totalorder (!%p416_p3), %s2050_s21, 1  ;;  %v2060_v0 = vmov (!%p416_p3), 0.0   ;;  %vm2061_vm0 = vmmov (!%p416_p3), 0   ;;  %vm513_vm1 = vcmask (!%p416_p3), 64512   ;;  %v836_v28 = vld [vmem:[%s2332_s4 + $0x8] sm:$0xff] (!%p416_p3)  ;;  %v672_v32 = vld [vmem:[%s2332_s4] sm:$0xff] (!%p416_p3) }
   0x7   : > { %419 = sbr.rel (%p416_p3) target bundleno = 3523 (0xdc3), region = 68  ;;  %1883 = vmatprep.subr.mxu0 (!%p416_p3), %v2060_v0  ;;  %1885 = vmatprep.mubr.msk.f32.mxu0 (!%p416_p3), %vm2061_vm0, %v2060_v0  ;;  %v1146_v56 = vld [vmem:[%s2332_s4 + $0x10] sm:$0xff] (!%p416_p3)  ;;  %vm1471_vm2 = vcmask (!%p416_p3), 261120   ;;  %vm1600_vm3 = vcmask (!%p416_p3), 523264  }
   0x8   : > { %1898 = vmatprep.subr.mxu1 (!%p416_p3), %v2060_v0  ;;  %1900 = vmatprep.mubr.msk.f32.mxu1 (!%p416_p3), %vm2061_vm0, %v2060_v0 }
   0xe   : > { %s2346_s21 = smov (!%p479_p4, %s2050_s21), 1 }
   0xf   : > { %s1842_s25 = sshll.u32 %s2346_s21, 5  ;;  %s1804_s29 = sshll.u32 %s2346_s21, 3 }
  0x10   : > { %s2158_s28 = scalar_lea.vmem %s2330_s2, %s1842_s25  ;;  %s2163_s13 = scalar_lea.vmem %s2329_s1, %s1842_s25 }
  0x11   : > { %v512_v1 = vld [vmem:[%s2158_s28] sm:$0xff]  ;;  %s2176_s16 = scalar_lea.vmem %s2331_s3, %s1842_s25  ;;  %v1815_v15 = vld [vmem:[%s2158_s28 + $0x8] sm:$0xff]  ;;  %v1822_v33 = vld [vmem:[%s2158_s28 + $0x10] sm:$0xff]  ;;  %s485_s14 = scalar_lea.vmem %s2328_s0, %s1804_s29 }
  0x12   : > { %v511_v2 = vld [vmem:[%s2163_s13] sm:$0xff]  ;;  %1884 = vmatpush3.msra.mxu0 %v512_v1  ;;  %v1814_v16 = vld [vmem:[%s2163_s13 + $0x8] sm:$0xff]  ;;  %v1821_v36 = vld [vmem:[%s2163_s13 + $0x10] sm:$0xff]  ;;  %s510_s30 = scalar_lea.vmem %s2340_s12, %s1804_s29 }
  0x13   : > { %1886 = vmatmul.mubr.msk.f32.vlgmr.msra.gmra.mrb[0].mxu0 %vm513_vm1, %v511_v2  ;;  %1888 = vmatprep.subr.mxu0 %v2060_v0  ;;  %v598_v11 = vld [vmem:[%s2176_s16] sm:$0xff]  ;;  %v1817_v27 = vld [vmem:[%s2176_s16 + $0x8] sm:$0xff]  ;;  %v1824_v50 = vld [vmem:[%s2176_s16 + $0x10] sm:$0xff] }
  0x14   : > { %1890 = vmatprep.mubr.msk.f32.mxu0 %vm2061_vm0, %v2060_v0  ;;  %1889 = vmatpush3.msra.mxu0 %v598_v11  ;;  %v1828_v54 = vld [vmem:[%s2158_s28 + $0x18] sm:$0xff] }
  0x15   : > { %1893 = vmatprep.subr.mxu0 %v2060_v0  ;;  %1899 = vmatpush3.msra.mxu1 %v1817_v27  ;;  %v1827_v55 = vld [vmem:[%s2163_s13 + $0x18] sm:$0xff]  ;;  %v1501_v27 = vld [vmem:[%s2336_s8 + $0x8] sm:$0xff] }
  0x16   : > { %1908 = vmatprep.subr.mxu1 %v2060_v0 }
  0xe6   : > { %v583_v3 = vpop.f32.mrb[0].mxu0 }
  0xe7   : > { %v1887_v4 = vpop.f32.mrb[1].mxu0  ;;  %v587_v5 = vsel %vm513_vm1, %v583_v3, -inf }
  0xe8   : > { %588 = vmax.xlane.f32.xlu0 %v587_v5  ;;  %v1830_v4 = vld [vmem:[%s2176_s16 + $0x18] sm:$0xff] }
  0xe9   : > { %v1384_v5 = vld [vmem:[%s2332_s4 + $0x18] sm:$0xff] }
 0x175   : > { %v589_v6 = vpop.xlane.xlu0 %588 }
 0x176   : > { %v590_v7 = vsub.f32 %v583_v3, %v589_v6 }
 0x178   : > { %v591_v8 = vmul.f32 1.442695, %v590_v7 }
 0x17a   : > { %2018 = vpow2.f32 %v591_v8 }
 0x184   : > { %v2019_v9 = vpop.eup %2018 }
 0x185   : > { %v593_v10 = vsel %vm513_vm1, %v2019_v9, 0.0 }
 0x186   : > { %594 = vadd.xlane.f32.xlu0 %v593_v10 }
 0x213   : > { %v595_v12 = vpop.xlane.xlu0 %594 }
 0x214   : > { %2020 = vrcp.f32 %v595_v12 }
 0x21e   : > { %v2021_v13 = vpop.eup %2020 }
 0x21f   : > { %v597_v14 = vmul.f32 %v2021_v13, %v2019_v9 }
 0x221   : > { %1891 = vmatmul.mubr.msk.f32.vlgmr.msra.gmra.mrb[2].mxu0 %vm513_vm1, %v597_v14 }
 0x222   : > { %1894 = vmatpush3.msra.mxu0 %v1815_v15  ;;  %1895 = vmatprep.mubr.msk.f32.mxu0 %vm2061_vm0, %v2060_v0  ;;  %v1459_v15 = vld [vmem:[%s485_s14] sm:$0xff] }
 0x223   : > { %1903 = vmatprep.subr.mxu0 %v2060_v0 }
 0x225   : > { %1896 = vmatmul.mubr.msk.f32.vlgmr.msra.gmra.mrb[4].mxu0 %vm513_vm1, %v1814_v16 }
 0x226   : > { %1905 = vmatprep.mubr.msk.f32.mxu0 %vm2061_vm0, %v2060_v0  ;;  %1904 = vmatpush3.msra.mxu0 %v836_v28 }
 0x227   : > { %1913 = vmatprep.subr.mxu0 %v2060_v0 }
 0x2f4   : > { %v668_v17 = vpop.f32.mrb[2].mxu0 }
 0x2f5   : > { %v1892_v18 = vpop.f32.mrb[3].mxu0 }
 0x2f6   : > { %v1833_v18 = vld [vmem:[%s2333_s5] ss:$0 sm:$0xff] }
 0x2f8   : > { %v746_v19 = vpop.f32.mrb[4].mxu0 }
 0x2f9   : > { %v1897_v20 = vpop.f32.mrb[5].mxu0  ;;  %v750_v21 = vsel %vm513_vm1, %v746_v19, -inf }
 0x2fa   : > { %751 = vmax.xlane.f32.xlu1 %v750_v21 }
 0x387   : > { %v752_v22 = vpop.xlane.xlu1 %751 }
 0x388   : > { %v753_v23 = vsub.f32 %v746_v19, %v752_v22 }
 0x38a   : > { %v754_v24 = vmul.f32 1.442695, %v753_v23 }
 0x38c   : > { %2022 = vpow2.f32 %v754_v24 }
 0x396   : > { %v2023_v25 = vpop.eup %2022 }
 0x397   : > { %v756_v26 = vsel %vm513_vm1, %v2023_v25, 0.0 }
 0x398   : > { %757 = vadd.xlane.f32.xlu1 %v756_v26  ;;  %v1500_v26 = vld [vmem:[%s2336_s8] sm:$0xff] }
 0x399   : > { %v1974_v28 = vpack.c.bf16 %v1501_v27, %v1500_v26 }
 0x425   : > { %v758_v29 = vpop.xlane.xlu1 %757 }
 0x426   : > { %2024 = vrcp.f32 %v758_v29  ;;  %v2062_v29 = vmov 0.0|0.0  }
 0x430   : > { %v2025_v30 = vpop.eup %2024 }
 0x431   : > { %v760_v31 = vmul.f32 %v2025_v30, %v2023_v25  ;;  %v1502_v30 = vld [vmem:[%s2336_s8 + $0x10] sm:$0xff] }
 0x433   : > { %1901 = vmatmul.mubr.msk.f32.vlgmr.msra.gmra.mrb[0].mxu1 %vm513_vm1, %v760_v31  ;;  %v1503_v31 = vld [vmem:[%s2336_s8 + $0x18] sm:$0xff] }
 0x434   : > { %1909 = vmatpush3.msra.mxu1 %v672_v32  ;;  %1910 = vmatprep.mubr.msk.f32.mxu1 %vm2061_vm0, %v2060_v0  ;;  %v1977_v32 = vpack.c.bf16 %v1503_v31, %v1502_v30 }
 0x435   : > { %1918 = vmatprep.subr.mxu1 %v2060_v0 }
 0x437   : > { %1911 = vmatmul.mubr.msk.f32.vlgmr.msra.gmra.mrb[2].mxu1 %vm513_vm1, %v668_v17 }
 0x438   : > { %1920 = vmatprep.mubr.msk.f32.mxu1 %vm2061_vm0, %v2060_v0  ;;  %1919 = vmatpush3.msra.mxu1 %v1824_v50 }
 0x439   : > { %1928 = vmatprep.subr.mxu1 %v2060_v0 }
 0x506   : > { %v832_v34 = vpop.f32.mrb[0].mxu1 }
 0x507   : > { %v1902_v35 = vpop.f32.mrb[1].mxu1  ;;  %1906 = vmatmul.mubr.msk.f32.vlgmr.msra.gmra.mrb[6].mxu0 %vm513_vm1, %v832_v34  ;;  %v1586_v34 = vld [vmem:[%s2338_s10 + $0x8] sm:$0xff] }
 0x508   : > { %1914 = vmatpush3.msra.mxu0 %v1822_v33  ;;  %1915 = vmatprep.mubr.msk.f32.mxu0 %vm2061_vm0, %v2060_v0  ;;  %v1585_v33 = vld [vmem:[%s2338_s10] sm:$0xff]  ;;  %v1587_v35 = vld [vmem:[%s2338_s10 + $0x10] sm:$0xff] }
 0x509   : > { %1923 = vmatprep.subr.mxu0 %v2060_v0 }
 0x50a   : > { %v979_v37 = vpop.f32.mrb[2].mxu1 }
 0x50b   : > { %v1912_v38 = vpop.f32.mrb[3].mxu1  ;;  %1916 = vmatmul.mubr.msk.f32.vlgmr.msra.gmra.mrb[8].mxu0 %vm513_vm1, %v1821_v36  ;;  %v1980_v36 = vpack.c.bf16 %v1586_v34, %v1585_v33 }
 0x50c   : > { %1925 = vmatprep.mubr.msk.f32.mxu0 %vm2061_vm0, %v2060_v0  ;;  %1924 = vmatpush3.msra.mxu0 %v1146_v56 }
 0x50d   : > { %1933 = vmatprep.subr.mxu0 %v2060_v0 }
 0x5da   : > { %v906_v39 = vpop.f32.mrb[6].mxu0 }
 0x5db   : > { %v980_v40 = vadd.f32 %v979_v37, %v906_v39  ;;  %v1907_v41 = vpop.f32.mrb[7].mxu0  ;;  %v1588_v37 = vld [vmem:[%s2338_s10 + $0x18] sm:$0xff]  ;;  %v1589_v39 = vld [vmem:[%s2338_s10 + $0x20] sm:$0xff] }
 0x5dc   : > { %v1983_v38 = vpack.c.bf16 %v1588_v37, %v1587_v35 }
 0x5de   : > { %v1056_v42 = vpop.f32.mrb[8].mxu0 }
 0x5df   : > { %v1917_v43 = vpop.f32.mrb[9].mxu0  ;;  %v1060_v44 = vsel %vm513_vm1, %v1056_v42, -inf }
 0x5e0   : > { %1061 = vmax.xlane.f32.xlu0 %v1060_v44 }
 0x66d   : > { %v1062_v45 = vpop.xlane.xlu0 %1061 }
 0x66e   : > { %v1063_v46 = vsub.f32 %v1056_v42, %v1062_v45 }
 0x670   : > { %v1064_v47 = vmul.f32 1.442695, %v1063_v46  ;;  %v1834_v46 = vld [vmem:[%s2334_s6] ss:$0 sm:$0xff] }
 0x672   : > { %2026 = vpow2.f32 %v1064_v47 }
 0x67c   : > { %v2027_v48 = vpop.eup %2026 }
 0x67d   : > { %v1066_v49 = vsel %vm513_vm1, %v2027_v48, 0.0 }
 0x67e   : > { %1067 = vadd.xlane.f32.xlu1 %v1066_v49 }
 0x70b   : > { %v1068_v51 = vpop.xlane.xlu1 %1067 }
 0x70c   : > { %2028 = vrcp.f32 %v1068_v51  ;;  %v1591_v51 = vld [vmem:[%s2338_s10 + $0x30] sm:$0xff] }
 0x716   : > { %v2029_v52 = vpop.eup %2028 }
 0x717   : > { %v1070_v53 = vmul.f32 %v2029_v52, %v2027_v48  ;;  %v1835_v48 = vld [vmem:[%s2335_s7] ss:$0 sm:$0xff]  ;;  %v1592_v52 = vld [vmem:[%s2338_s10 + $0x38] sm:$0xff] }
 0x719   : > { %1921 = vmatmul.mubr.msk.f32.vlgmr.msra.gmra.mrb[4].mxu1 %vm513_vm1, %v1070_v53  ;;  %v1989_v53 = vpack.c.bf16 %v1592_v52, %v1591_v51 }
 0x71a   : > { %1929 = vmatpush3.msra.mxu1 %v1828_v54  ;;  %1930 = vmatprep.mubr.msk.f32.mxu1 %vm2061_vm0, %v2060_v0  ;;  %v1836_v54 = vld [vmem:[%s2337_s9] ss:$0 sm:$0xff] }
 0x71b   : > { %1938 = vmatprep.subr.mxu1 %v2060_v0 }
 0x71d   : > { %1931 = vmatmul.mubr.msk.f32.vlgmr.msra.gmra.mrb[6].mxu1 %vm513_vm1, %v1827_v55 }
 0x71e   : > { %1940 = vmatprep.mubr.msk.f32.mxu1 %vm2061_vm0, %v2060_v0  ;;  %1939 = vmatpush3.msra.mxu1 %v1384_v5 }
 0x71f   : > { %1979 = vmatprep.subr.bf16.mxu1 %v2062_v29 }
 0x7ec   : > { %v1142_v57 = vpop.f32.mrb[4].mxu1 }
 0x7ed   : > { %v1922_v58 = vpop.f32.mrb[5].mxu1  ;;  %1926 = vmatmul.mubr.msk.f32.vlgmr.msra.gmra.mrb[10].mxu0 %vm513_vm1, %v1142_v57 }
 0x7ee   : > { %1935 = vmatprep.mubr.msk.f32.mxu0 %vm2061_vm0, %v2060_v0  ;;  %1934 = vmatpush3.msra.mxu0 %v1830_v4 }
 0x7ef   : > { %1973 = vmatprep.subr.bf16.mxu0 %v2062_v29 }
 0x7f0   : > { %v1294_v59 = vpop.f32.mrb[6].mxu1 }
 0x7f1   : > { %v1932_v60 = vpop.f32.mrb[7].mxu1  ;;  %v1298_v61 = vsel %vm513_vm1, %v1294_v59, -inf }
 0x7f2   : > { %1299 = vmax.xlane.f32.xlu0 %v1298_v61 }
 0x87f   : > { %v1300_v62 = vpop.xlane.xlu0 %1299 }
 0x880   : > { %v1301_v63 = vsub.f32 %v1294_v59, %v1300_v62  ;;  %v1838_v59 = vld [vmem:[%s2339_s11] ss:$0 sm:$0xff] }
 0x882   : > { %v1302_v1 = vmul.f32 1.442695, %v1301_v63 }
 0x884   : > { %2030 = vpow2.f32 %v1302_v1 }
 0x88e   : > { %v2031_v2 = vpop.eup %2030 }
 0x88f   : > { %v1304_v3 = vsel %vm513_vm1, %v2031_v2, 0.0 }
 0x890   : > { %1305 = vadd.xlane.f32.xlu1 %v1304_v3 }
 0x8c0   : > { %v1216_v6 = vpop.f32.mrb[10].mxu0 }
 0x8c1   : > { %v1220_v7 = vadd.f32 %v1216_v6, %v980_v40  ;;  %v1927_v8 = vpop.f32.mrb[11].mxu0  ;;  %v1590_v40 = vld [vmem:[%s2338_s10 + $0x28] sm:$0xff] }
 0x8c2   : > { %v1986_v41 = vpack.c.bf16 %v1590_v40, %v1589_v39 }
 0x91d   : > { %v1306_v9 = vpop.xlane.xlu1 %1305 }
 0x91e   : > { %2032 = vrcp.f32 %v1306_v9 }
 0x928   : > { %v2033_v10 = vpop.eup %2032 }
 0x929   : > { %v1308_v11 = vmul.f32 %v2033_v10, %v2031_v2 }
 0x92b   : > { %1936 = vmatmul.mubr.msk.f32.vlgmr.msra.gmra.mrb[12].mxu0 %vm513_vm1, %v1308_v11 }
 0x92c   : > { %1951 = vmatprep.mubr.msk.f32.mxu0 %vm2061_vm0, %v2060_v0  ;;  %1975 = vmatpush3.bf16.msra.mxu0 %v1974_v28 }
 0x92d   : > { %1976 = vmatprep.subr.bf16.mxu0 %v2062_v29 }
 0x930   : > { %1978 = vmatpush3.bf16.msra.mxu0 %v1977_v32 }
 0x9fe   : > { %v1380_v12 = vpop.f32.mrb[12].mxu0 }
 0x9ff   : > { %v1937_v13 = vpop.f32.mrb[13].mxu0  ;;  %1941 = vmatmul.mubr.msk.f32.vlgmr.msra.gmra.mrb[8].mxu1 %vm513_vm1, %v1380_v12 }
 0xa00   : > { %1970 = vmatprep.mubr.msk.f32.mxu1 %vm2061_vm0, %v2060_v0  ;;  %1981 = vmatpush3.bf16.msra.mxu1 %v1980_v36 }
 0xa01   : > { %1982 = vmatprep.subr.bf16.mxu1 %v2062_v29 }
 0xa04   : > { %1984 = vmatpush3.bf16.msra.mxu1 %v1983_v38 }
 0xa05   : > { %1985 = vmatprep.subr.bf16.mxu1 %v2062_v29 }
 0xa08   : > { %1987 = vmatpush3.bf16.msra.mxu1 %v1986_v41 }
 0xa09   : > { %1988 = vmatprep.subr.bf16.mxu1 %v2062_v29 }
 0xa0c   : > { %1990 = vmatpush3.bf16.msra.mxu1 %v1989_v53 }
 0xad2   : > { %v1454_v14 = vpop.f32.mrb[8].mxu1 }
 0xad3   : > { %v1458_v16 = vadd.f32 %v1454_v14, %v1220_v7  ;;  %v1942_v17 = vpop.f32.mrb[9].mxu1 }
 0xad5   : > { %v1460_v19 = vadd.f32 %v1459_v15, %v1458_v16 }
 0xad7   : > { %v2257_v20 = vadd.f32 %v1833_v18, %v1460_v19 }
 0xad9   : > { %v1472_v0 = vsel %vm1471_vm2, %v2257_v20, 0.0 }
 0xada   : > { %1473 = vadd.xlane.f32.xlu0 %v1472_v0 }
 0xb67   : > { %v1474_v21 = vpop.xlane.xlu0 %1473 }
 0xb68   : > { %v1476_v22 = vmul.f32 0.03125, %v1474_v21 }
 0xb6a   : > { %v1477_v23 = vsub.f32 %v2257_v20, %v1476_v22 }
 0xb6c   : > { %v1478_v24 = vmul.f32 %v1477_v23, %v1477_v23 }
 0xb6e   : > { %v1479_v25 = vsel %vm1471_vm2, %v1478_v24, 0.0 }
 0xb6f   : > { %1480 = vadd.xlane.f32.xlu1 %v1479_v25 }
 0xbfc   : > { %v1481_v42 = vpop.xlane.xlu1 %1480 }
 0xbfd   : > { %v1482_v43 = vmul.f32 0.03125, %v1481_v42 }
 0xbff   : > { %v1483_v44 = vadd.f32 1e-05, %v1482_v43 }
 0xc01   : > { %2034 = vrsqrt.f32 %v1483_v44 }
 0xc0b   : > { %v2035_v45 = vpop.eup %2034 }
 0xc0c   : > { %v1485_v47 = vmul.f32 %v2035_v45, %v1477_v23 }
 0xc0e   : > { %v1492_v49 = vmul.f32 %v1834_v46, %v1485_v47 }
 0xc10   : > { %v1499_v50 = vadd.f32 %v1835_v48, %v1492_v49 }
 0xc12   : > { %1952 = vmatmul.mubr.msk.f32.vlgmr.msra.gmra.mrb[14].mxu0 %vm1471_vm2, %v1499_v50 }
 0xce5   : > { %v1580_v55 = vpop.f32.mrb[14].mxu0 }
 0xce6   : > { %v1581_v56 = vadd.f32 %v1836_v54, %v1580_v55  ;;  %v1953_v57 = vpop.f32.mrb[15].mxu0 }
 0xce8   : > { %v1584_v58 = vmax.f32 %v1581_v56, 0.0 }
 0xcea   : > { %1971 = vmatmul.mubr.msk.f32.vlgmr.msra.gmra.mrb[10].mxu1 %vm1600_vm3, %v1584_v58 }
 0xdbd   : > { %v1670_v60 = vpop.f32.mrb[10].mxu1 }
 0xdbe   : > { %v1671_v61 = vadd.f32 %v1838_v59, %v1670_v60  ;;  %v1972_v62 = vpop.f32.mrb[11].mxu1 }
 0xdc0   : > { %v1674_v63 = vadd.f32 %v1671_v61, %v2257_v20 }
 0xdc2   : > { %1675 = vst.msk [vmem:[%s510_s30] sm:$0xff] %vm1471_vm2, %v1674_v63 }
 0xdc3 PF: > { %s22_s23 = sadd.s32 1, %s2058_s23   ;;  %s2341_s21 = smov %s2054_s22 }
 0xdc4   : > { %p19_p5 = scmp.ge.s32.totalorder %s22_s23, 4   ;;  %s2342_s22 = smov %s2344_s24 }
 0xdc6   :  { %21 = sbr.rel (!%p19_p5) target bundleno = 2 (0x2), region = 116 }

</bundles_post_ra>
